<compile_context>
chip_gen: v7x
topology: tpu7x:2x2x1
jax: 0.10.0
libtpu: 0.0.40
codegen_flags: <defaults>
</compile_context>

<pallas_src>
import jax
import jax.numpy as jnp
from jax.experimental import pallas as pl
from jax.experimental.pallas import tpu as pltpu

LANE = 128            # lane width of a vreg
SUBLANE_BF16 = 16     # bf16 packs 16 rows per sublane tile
MAX_BATCH_TILE = 1024 # rows per grid step (512-1024 hits the HBM roofline sweet spot)
SMALL_BATCH_MAX = 128 # at/below this, skip Pallas entirely (dispatch-bound regime)


def _round_up(x, m):
    return (x + m - 1) // m * m


# ----------------------------------------------------------------------------
# Pallas kernel: full MLP hot path (5 matmuls + ReLUs) on one batch tile.
# ----------------------------------------------------------------------------
def reward_mlp_kernel(s_ref, a_ref,
                      w1s_ref, w1a_ref, b1_ref,
                      w2_ref, b2_ref,
                      w3_ref, b3_ref,
                      w4_ref, b4_ref,
                      wh_ref, bh_ref,
                      o_ref):
    # s: (TB, S) bf16, a: (TB, 1) bf16.  Weights bf16 (lane-padded to 128),
    # biases / w1a f32.  MXU accumulates in f32; bias-add & ReLU stay f32.
    #
    # Layer 1, with the concat fused away:
    #   [state, action] @ W1 == state @ W1[:S]  +  action * W1[S]
    h = jnp.dot(s_ref[...], w1s_ref[...], preferred_element_type=jnp.float32)
    h = h + a_ref[...].astype(jnp.float32) * w1a_ref[...] + b1_ref[...]
    h = jnp.maximum(h, 0.0)                                        # relu(lin1)

    h = jnp.dot(h.astype(jnp.bfloat16), w2_ref[...],
                preferred_element_type=jnp.float32) + b2_ref[...]
    h = jnp.maximum(h, 0.0)                                        # relu(lin2)
    # d1: dropout(p=0.75) in eval mode == identity

    h = jnp.dot(h.astype(jnp.bfloat16), w3_ref[...],
                preferred_element_type=jnp.float32) + b3_ref[...]
    h = jnp.maximum(h, 0.0)                                        # relu(lin3)
    # d2: dropout(p=0.75) in eval mode == identity

    h = jnp.dot(h.astype(jnp.bfloat16), w4_ref[...],
                preferred_element_type=jnp.float32) + b4_ref[...]
    h = jnp.maximum(h, 0.0)                                        # relu(lin4)

    # Head, emitted as a lane-dense bf16 tile (halves writeback bytes).
    o_ref[...] = (jnp.dot(h.astype(jnp.bfloat16), wh_ref[...],
                          preferred_element_type=jnp.float32)
                  + bh_ref[...]).astype(o_ref.dtype)


# ----------------------------------------------------------------------------
# Parameter construction (deterministic, mimics nn.Linear's U(-1/sqrt(fan_in)))
# ----------------------------------------------------------------------------
def init_linear(key, in_f, out_f):
    kw, kb = jax.random.split(key)
    bound = 1.0 / jnp.sqrt(jnp.float32(in_f))
    w = jax.random.uniform(kw, (in_f, out_f), jnp.float32, -bound, bound)
    b = jax.random.uniform(kb, (out_f,), jnp.float32, -bound, bound)
    return w, b


def init_reward_model_params(key, state_size, hidden_size):
    k1, k2, k3, k4, kh = jax.random.split(key, 5)
    p = {}
    p["w1"], p["b1"] = init_linear(k1, state_size + 1, hidden_size // 2)
    p["w2"], p["b2"] = init_linear(k2, hidden_size // 2, hidden_size)
    p["w3"], p["b3"] = init_linear(k3, hidden_size, hidden_size)
    p["w4"], p["b4"] = init_linear(k4, hidden_size, hidden_size)
    p["wh"], p["bh"] = init_linear(kh, hidden_size, 5)
    return p


def pad_params(params, state_size):
    """Zero-pad every feature dim to a multiple of 128 lanes (NOT 256).

    Matmul-operand weights are bf16; biases (and the 1-row action column of
    W1) stay f32.  Zero padding guarantees padded columns / hidden units
    contribute exactly 0 to the real outputs.  W1 is split into its state rows
    (w1s) and its action row (w1a) so the kernel never needs a concat.
    """
    pp = {}
    w1, b1 = params["w1"], params["b1"]
    n1 = _round_up(w1.shape[1], LANE)
    w1p = jnp.zeros((w1.shape[0], n1), jnp.float32).at[:, :w1.shape[1]].set(w1)
    pp["w1s"] = w1p[:state_size].astype(jnp.bfloat16)          # (S, 128)   bf16
    pp["w1a"] = w1p[state_size:state_size + 1]                 # (1, 128)   f32
    pp["b1"] = jnp.zeros((1, n1), jnp.float32).at[0, :b1.shape[0]].set(b1)
    for name in ("2", "3", "4", "h"):
        w, b = params["w" + name], params["b" + name]
        kp = _round_up(w.shape[0], LANE)
        np_ = _round_up(w.shape[1], LANE)
        wp = jnp.zeros((kp, np_), jnp.float32).at[:w.shape[0], :w.shape[1]].set(w)
        bp_ = jnp.zeros((1, np_), jnp.float32).at[0, :b.shape[0]].set(b)
        pp["w" + name] = wp.astype(jnp.bfloat16)
        pp["b" + name] = bp_
    return pp


# ----------------------------------------------------------------------------
# Pure-jnp mirror of the kernel math (bf16 operands, f32 accumulate).
# Used as the small-batch fast path and as the matched reference.
# ----------------------------------------------------------------------------
def _mlp_math(state_f32, action_f32, pp):
    s = state_f32.astype(jnp.bfloat16)
    a = action_f32.astype(jnp.bfloat16).astype(jnp.float32)
    h = jnp.dot(s, pp["w1s"], preferred_element_type=jnp.float32)
    h = jnp.maximum(h + a * pp["w1a"] + pp["b1"], 0.0)
    for n in ("2", "3", "4"):
        h = jnp.maximum(
            jnp.dot(h.astype(jnp.bfloat16), pp["w" + n],
                    preferred_element_type=jnp.float32) + pp["b" + n], 0.0)
    return jnp.dot(h.astype(jnp.bfloat16), pp["wh"],
                   preferred_element_type=jnp.float32) + pp["bh"]


def _choose_batch_tile(B):
    """Rows per grid step: capped at MAX_BATCH_TILE to amortize per-step
    overhead, but always >= 2 grid steps for non-trivial batches so both v7x
    TensorCores get work under dimension_semantics=("parallel",)."""
    bp_min = _round_up(B, SUBLANE_BF16)
    tb = min(MAX_BATCH_TILE, _round_up(pl.cdiv(bp_min, 2), SUBLANE_BF16))
    return max(tb, SUBLANE_BF16)


# ----------------------------------------------------------------------------
# Forward wrapper.
# ----------------------------------------------------------------------------
def reward_model_forward(state_batch, action_batch, pp, state_size,
                         small_batch_max=SMALL_BATCH_MAX):
    # resize_input semantics of the PyTorch module: a single flat sample
    # (shape (state_size,) or leading dim 1) becomes a (1, state_size) batch.
    if state_batch.ndim == 1 or state_batch.shape[0] == 1:
        state_batch = state_batch.reshape(1, state_size)
        action_batch = action_batch.reshape(1, 1)

    B = state_batch.shape[0]
    state_f32 = state_batch.astype(jnp.float32).reshape(B, state_size)
    action_f32 = action_batch.astype(jnp.float32).reshape(B, 1)

    # Small-batch fast path: RL-style batches are dispatch-bound; Pallas
    # overhead cannot win, so run the 5 tiny matmuls in plain jnp.
    if B <= small_batch_max:
        return _mlp_math(state_f32, action_f32, pp)[:, :5]

    tb = _choose_batch_tile(B)
    bp = _round_up(B, tb)

    # bf16 input streams, batch-padded to whole tiles.  No 128-wide staged
    # concat buffer: layer-1's concat is folded into the kernel via the W1
    # split (state rows vs. action row).
    s_bf = jnp.pad(state_f32, ((0, bp - B), (0, 0))).astype(jnp.bfloat16)
    a_bf = jnp.pad(action_f32, ((0, bp - B), (0, 0))).astype(jnp.bfloat16)

    weights = (pp["w1s"], pp["w1a"], pp["b1"],
               pp["w2"], pp["b2"],
               pp["w3"], pp["b3"],
               pp["w4"], pp["b4"],
               pp["wh"], pp["bh"])
    dp_out = pp["wh"].shape[1]  # 128 (lane-dense head output)

    flops = 2 * bp * (int(pp["w1s"].shape[0]) * int(pp["w1s"].shape[1])
                      + sum(int(pp["w" + n].shape[0]) * int(pp["w" + n].shape[1])
                            for n in ("2", "3", "4", "h")))
    bytes_accessed = (int(s_bf.size) * 2 + int(a_bf.size) * 2
                      + int(bp) * int(dp_out) * 2
                      + sum(int(a.size) * a.dtype.itemsize for a in weights))

    def run(single_buffer_weights):
        def resident(a):
            # Full-extent block, constant index_map -> DMA'd once, stays
            # VMEM-resident across all batch tiles.
            idx = lambda i, nd=a.ndim: (0,) * nd
            if single_buffer_weights:
                return pl.BlockSpec(a.shape, idx, memory_space=pltpu.VMEM,
                                    pipeline_mode=pl.Buffered(1))
            return pl.BlockSpec(a.shape, idx, memory_space=pltpu.VMEM)

        return pl.pallas_call(
            reward_mlp_kernel,
            out_shape=jax.ShapeDtypeStruct((bp, dp_out), jnp.bfloat16),
            grid=(bp // tb,),
            in_specs=[pl.BlockSpec((tb, state_size), lambda i: (i, 0),
                                   memory_space=pltpu.VMEM),
                      pl.BlockSpec((tb, 1), lambda i: (i, 0),
                                   memory_space=pltpu.VMEM)]
                     + [resident(a) for a in weights],
            out_specs=pl.BlockSpec((tb, dp_out), lambda i: (i, 0),
                                   memory_space=pltpu.VMEM),
            compiler_params=pltpu.CompilerParams(
                # Batch axis is embarrassingly parallel -> megacore sharding.
                dimension_semantics=("parallel",)),
            cost_estimate=pl.CostEstimate(
                flops=flops, transcendentals=0, bytes_accessed=bytes_accessed),
        )(s_bf, a_bf, *weights)

    try:
        out_padded = run(single_buffer_weights=True)
    except Exception:
        # pipeline_mode=pl.Buffered(1) unsupported on this jax/mosaic version:
        # fall back to default double-buffering (costs ~0.2 MiB VMEM, harmless).
        out_padded = run(single_buffer_weights=False)

    # Drop padded batch rows / padded head lanes; return f32 scores like the
    # PyTorch module.
    return out_padded[:B, :5].astype(jnp.float32)


# ----------------------------------------------------------------------------
# Full-f32 reference matching the PyTorch module (eval-mode dropout).
# ----------------------------------------------------------------------------
def reward_model_ref_f32(state_batch, action_batch, p, state_size):
    if state_batch.ndim == 1 or state_batch.shape[0] == 1:
        state_batch = state_batch.reshape(1, state_size)
        action_batch = action_batch.reshape(1, 1)
    x = jnp.concatenate([state_batch.astype(jnp.float32),
                         action_batch.astype(jnp.float32).reshape(-1, 1)], axis=-1)
    h = jnp.maximum(x @ p["w1"] + p["b1"], 0.0)
    h = jnp.maximum(h @ p["w2"] + p["b2"], 0.0)
    h = jnp.maximum(h @ p["w3"] + p["b3"], 0.0)
    h = jnp.maximum(h @ p["w4"] + p["b4"], 0.0)
    return h @ p["wh"] + p["bh"]


if __name__ == "__main__":
    state_size = 16
    action_size = 1
    hidden_size = 32

    key = jax.random.PRNGKey(0)
    k_params, k_state, k_action = jax.random.split(key, 3)

    params = init_reward_model_params(k_params, state_size, hidden_size)
    padded_params = pad_params(params, state_size)

    # --- Kernel path: batch large enough to stream (grid of 2 batch tiles). ---
    B = 160
    state_batch = jax.random.normal(k_state, (B, state_size), jnp.float32)
    action_batch = jax.random.randint(
        k_action, (B, 1), 0, 5).astype(jnp.float32)

    out = reward_model_forward(state_batch, action_batch, padded_params,
                               state_size)
    out = jax.block_until_ready(out)
    assert out.shape == (B, 5), out.shape

    # Matched-math check (same bf16-operand / f32-accumulate recipe; the only
    # extra rounding in the kernel is the bf16 output store).
    matched = _mlp_math(state_batch.astype(jnp.float32),
                        action_batch.astype(jnp.float32),
                        padded_params)[:, :5]
    err_m = jnp.max(jnp.abs(out - matched))
    assert jnp.allclose(out, matched, atol=2e-2, rtol=2e-2), \
        f"kernel vs matched-ref max err {err_m}"

    # Semantic check against the full-f32 PyTorch-equivalent forward.
    ref32 = reward_model_ref_f32(state_batch, action_batch, params, state_size)
    err_r = jnp.max(jnp.abs(out - ref32))
    assert jnp.allclose(out, ref32, atol=1e-1, rtol=1e-1), \
        f"kernel vs f32-ref max err {err_r}"

    # --- Small-batch fast path (RL-style B=4, dispatch-bound) ---------------
    Bs = 4
    out_small = reward_model_forward(state_batch[:Bs], action_batch[:Bs],
                                     padded_params, state_size)
    out_small = jax.block_until_ready(out_small)
    assert out_small.shape == (Bs, 5), out_small.shape
    assert jnp.allclose(out_small, out[:Bs], atol=2e-2, rtol=2e-2)

    # --- Single flat sample (resize_input path) ------------------------------
    out_one = reward_model_forward(state_batch[0], action_batch[0],
                                   padded_params, state_size)
    out_one = jax.block_until_ready(out_one)
    assert out_one.shape == (1, 5), out_one.shape

    print("KERNEL_OK")
</pallas_src>

<mosaic_0001>
module attributes {stable_mosaic.version = 11 : i64} {
  func.func @reward_mlp_kernel(%arg0: i32, %arg1: memref<80x16xbf16, #tpu.memory_space<vmem>>, %arg2: memref<80x1xbf16, #tpu.memory_space<vmem>>, %arg3: memref<16x128xbf16, #tpu.memory_space<vmem>>, %arg4: memref<1x128xf32, #tpu.memory_space<vmem>>, %arg5: memref<1x128xf32, #tpu.memory_space<vmem>>, %arg6: memref<128x128xbf16, #tpu.memory_space<vmem>>, %arg7: memref<1x128xf32, #tpu.memory_space<vmem>>, %arg8: memref<128x128xbf16, #tpu.memory_space<vmem>>, %arg9: memref<1x128xf32, #tpu.memory_space<vmem>>, %arg10: memref<128x128xbf16, #tpu.memory_space<vmem>>, %arg11: memref<1x128xf32, #tpu.memory_space<vmem>>, %arg12: memref<128x128xbf16, #tpu.memory_space<vmem>>, %arg13: memref<1x128xf32, #tpu.memory_space<vmem>>, %arg14: memref<80x128xbf16, #tpu.memory_space<vmem>>) attributes {dimension_semantics = [#tpu.dimension_semantics<parallel>], iteration_bounds = array<i64: 2>, scalar_prefetch = 0 : i64, scratch_operands = 0 : i64, tpu.core_type = #tpu.core_type<tc>, window_params = [{transform_indices = @transform_0, window_bounds = array<i64: 80, 16>}, {transform_indices = @transform_1, window_bounds = array<i64: 80, 1>}, {pipeline_mode = #tpu.pipeline_mode<synchronous>, transform_indices = @transform_2, window_bounds = array<i64: 16, 128>}, {pipeline_mode = #tpu.pipeline_mode<synchronous>, transform_indices = @transform_3, window_bounds = array<i64: 1, 128>}, {pipeline_mode = #tpu.pipeline_mode<synchronous>, transform_indices = @transform_4, window_bounds = array<i64: 1, 128>}, {pipeline_mode = #tpu.pipeline_mode<synchronous>, transform_indices = @transform_5, window_bounds = array<i64: 128, 128>}, {pipeline_mode = #tpu.pipeline_mode<synchronous>, transform_indices = @transform_6, window_bounds = array<i64: 1, 128>}, {pipeline_mode = #tpu.pipeline_mode<synchronous>, transform_indices = @transform_7, window_bounds = array<i64: 128, 128>}, {pipeline_mode = #tpu.pipeline_mode<synchronous>, transform_indices = @transform_8, window_bounds = array<i64: 1, 128>}, {pipeline_mode = #tpu.pipeline_mode<synchronous>, transform_indices = @transform_9, window_bounds = array<i64: 128, 128>}, {pipeline_mode = #tpu.pipeline_mode<synchronous>, transform_indices = @transform_10, window_bounds = array<i64: 1, 128>}, {pipeline_mode = #tpu.pipeline_mode<synchronous>, transform_indices = @transform_11, window_bounds = array<i64: 128, 128>}, {pipeline_mode = #tpu.pipeline_mode<synchronous>, transform_indices = @transform_12, window_bounds = array<i64: 1, 128>}, {transform_indices = @transform_13, window_bounds = array<i64: 80, 128>}]} {
    %c0 = arith.constant 0 : index
    %c0_0 = arith.constant 0 : index
    %0 = vector.load %arg1[%c0, %c0_0] : memref<80x16xbf16, #tpu.memory_space<vmem>>, vector<80x16xbf16>
    %c0_1 = arith.constant 0 : index
    %c0_2 = arith.constant 0 : index
    %1 = vector.load %arg3[%c0_1, %c0_2] : memref<16x128xbf16, #tpu.memory_space<vmem>>, vector<16x128xbf16>
    %cst = arith.constant dense<0.000000e+00> : vector<80x128xf32>
    %2 = tpu.matmul %0, %1, %cst {dimension_numbers = #tpu.dot_dimension_numbers<[1], [0], [0], [1], [0, 0, 1, 1], [], []>} : vector<80x16xbf16>, vector<16x128xbf16>, vector<80x128xf32> -> vector<80x128xf32>
    %c0_3 = arith.constant 0 : index
    %c0_4 = arith.constant 0 : index
    %3 = vector.load %arg2[%c0_3, %c0_4] : memref<80x1xbf16, #tpu.memory_space<vmem>>, vector<80x1xbf16>
    %4 = arith.extf %3 : vector<80x1xbf16> to vector<80x1xf32>
    %c0_5 = arith.constant 0 : index
    %c0_6 = arith.constant 0 : index
    %5 = vector.load %arg4[%c0_5, %c0_6] : memref<1x128xf32, #tpu.memory_space<vmem>>, vector<1x128xf32>
    %6 = vector.broadcast %4 : vector<80x1xf32> to vector<80x128xf32>
    %7 = vector.broadcast %5 : vector<1x128xf32> to vector<80x128xf32>
    %8 = arith.mulf %6, %7 : vector<80x128xf32>
    %9 = arith.addf %2, %8 : vector<80x128xf32>
    %c0_7 = arith.constant 0 : index
    %c0_8 = arith.constant 0 : index
    %10 = vector.load %arg5[%c0_7, %c0_8] : memref<1x128xf32, #tpu.memory_space<vmem>>, vector<1x128xf32>
    %11 = vector.broadcast %10 : vector<1x128xf32> to vector<80x128xf32>
    %12 = arith.addf %9, %11 : vector<80x128xf32>
    %cst_9 = arith.constant 0.000000e+00 : f32
    %13 = vector.broadcast %cst_9 : f32 to vector<80x128xf32>
    %14 = arith.maximumf %12, %13 : vector<80x128xf32>
    %15 = arith.truncf %14 : vector<80x128xf32> to vector<80x128xbf16>
    %c0_10 = arith.constant 0 : index
    %c0_11 = arith.constant 0 : index
    %16 = vector.load %arg6[%c0_10, %c0_11] : memref<128x128xbf16, #tpu.memory_space<vmem>>, vector<128x128xbf16>
    %cst_12 = arith.constant dense<0.000000e+00> : vector<80x128xf32>
    %17 = tpu.matmul %15, %16, %cst_12 {dimension_numbers = #tpu.dot_dimension_numbers<[1], [0], [0], [1], [0, 0, 1, 1], [], []>} : vector<80x128xbf16>, vector<128x128xbf16>, vector<80x128xf32> -> vector<80x128xf32>
    %c0_13 = arith.constant 0 : index
    %c0_14 = arith.constant 0 : index
    %18 = vector.load %arg7[%c0_13, %c0_14] : memref<1x128xf32, #tpu.memory_space<vmem>>, vector<1x128xf32>
    %19 = vector.broadcast %18 : vector<1x128xf32> to vector<80x128xf32>
    %20 = arith.addf %17, %19 : vector<80x128xf32>
    %cst_15 = arith.constant 0.000000e+00 : f32
    %21 = vector.broadcast %cst_15 : f32 to vector<80x128xf32>
    %22 = arith.maximumf %20, %21 : vector<80x128xf32>
    %23 = arith.truncf %22 : vector<80x128xf32> to vector<80x128xbf16>
    %c0_16 = arith.constant 0 : index
    %c0_17 = arith.constant 0 : index
    %24 = vector.load %arg8[%c0_16, %c0_17] : memref<128x128xbf16, #tpu.memory_space<vmem>>, vector<128x128xbf16>
    %cst_18 = arith.constant dense<0.000000e+00> : vector<80x128xf32>
    %25 = tpu.matmul %23, %24, %cst_18 {dimension_numbers = #tpu.dot_dimension_numbers<[1], [0], [0], [1], [0, 0, 1, 1], [], []>} : vector<80x128xbf16>, vector<128x128xbf16>, vector<80x128xf32> -> vector<80x128xf32>
    %c0_19 = arith.constant 0 : index
    %c0_20 = arith.constant 0 : index
    %26 = vector.load %arg9[%c0_19, %c0_20] : memref<1x128xf32, #tpu.memory_space<vmem>>, vector<1x128xf32>
    %27 = vector.broadcast %26 : vector<1x128xf32> to vector<80x128xf32>
    %28 = arith.addf %25, %27 : vector<80x128xf32>
    %cst_21 = arith.constant 0.000000e+00 : f32
    %29 = vector.broadcast %cst_21 : f32 to vector<80x128xf32>
    %30 = arith.maximumf %28, %29 : vector<80x128xf32>
    %31 = arith.truncf %30 : vector<80x128xf32> to vector<80x128xbf16>
    %c0_22 = arith.constant 0 : index
    %c0_23 = arith.constant 0 : index
    %32 = vector.load %arg10[%c0_22, %c0_23] : memref<128x128xbf16, #tpu.memory_space<vmem>>, vector<128x128xbf16>
    %cst_24 = arith.constant dense<0.000000e+00> : vector<80x128xf32>
    %33 = tpu.matmul %31, %32, %cst_24 {dimension_numbers = #tpu.dot_dimension_numbers<[1], [0], [0], [1], [0, 0, 1, 1], [], []>} : vector<80x128xbf16>, vector<128x128xbf16>, vector<80x128xf32> -> vector<80x128xf32>
    %c0_25 = arith.constant 0 : index
    %c0_26 = arith.constant 0 : index
    %34 = vector.load %arg11[%c0_25, %c0_26] : memref<1x128xf32, #tpu.memory_space<vmem>>, vector<1x128xf32>
    %35 = vector.broadcast %34 : vector<1x128xf32> to vector<80x128xf32>
    %36 = arith.addf %33, %35 : vector<80x128xf32>
    %cst_27 = arith.constant 0.000000e+00 : f32
    %37 = vector.broadcast %cst_27 : f32 to vector<80x128xf32>
    %38 = arith.maximumf %36, %37 : vector<80x128xf32>
    %39 = arith.truncf %38 : vector<80x128xf32> to vector<80x128xbf16>
    %c0_28 = arith.constant 0 : index
    %c0_29 = arith.constant 0 : index
    %40 = vector.load %arg12[%c0_28, %c0_29] : memref<128x128xbf16, #tpu.memory_space<vmem>>, vector<128x128xbf16>
    %cst_30 = arith.constant dense<0.000000e+00> : vector<80x128xf32>
    %41 = tpu.matmul %39, %40, %cst_30 {dimension_numbers = #tpu.dot_dimension_numbers<[1], [0], [0], [1], [0, 0, 1, 1], [], []>} : vector<80x128xbf16>, vector<128x128xbf16>, vector<80x128xf32> -> vector<80x128xf32>
    %c0_31 = arith.constant 0 : index
    %c0_32 = arith.constant 0 : index
    %42 = vector.load %arg13[%c0_31, %c0_32] : memref<1x128xf32, #tpu.memory_space<vmem>>, vector<1x128xf32>
    %43 = vector.broadcast %42 : vector<1x128xf32> to vector<80x128xf32>
    %44 = arith.addf %41, %43 : vector<80x128xf32>
    %45 = arith.truncf %44 : vector<80x128xf32> to vector<80x128xbf16>
    %c0_33 = arith.constant 0 : index
    %c0_34 = arith.constant 0 : index
    %46 = vector.load %arg14[%c0_33, %c0_34] : memref<80x128xbf16, #tpu.memory_space<vmem>>, vector<80x128xbf16>
    tpu.vector_store %arg14[%c0_33, %c0_34], %45 {strides = array<i32>} : memref<80x128xbf16, #tpu.memory_space<vmem>>, vector<80x128xbf16>,
    return
  }
  func.func @transform_0(%arg0: i32) -> (i32, i32) {
    %c0_i32 = arith.constant 0 : i32
    %c0_i32_0 = arith.constant 0 : i32
    return %arg0, %c0_i32 : i32, i32
  }
  func.func @transform_1(%arg0: i32) -> (i32, i32) {
    %c0_i32 = arith.constant 0 : i32
    %c0_i32_0 = arith.constant 0 : i32
    return %arg0, %c0_i32 : i32, i32
  }
  func.func @transform_2(%arg0: i32) -> (i32, i32) {
    %c0_i32 = arith.constant 0 : i32
    %c0_i32_0 = arith.constant 0 : i32
    %c0_i32_1 = arith.constant 0 : i32
    return %c0_i32, %c0_i32_0 : i32, i32
  }
  func.func @transform_3(%arg0: i32) -> (i32, i32) {
    %c0_i32 = arith.constant 0 : i32
    %c0_i32_0 = arith.constant 0 : i32
    %c0_i32_1 = arith.constant 0 : i32
    return %c0_i32, %c0_i32_0 : i32, i32
  }
  func.func @transform_4(%arg0: i32) -> (i32, i32) {
    %c0_i32 = arith.constant 0 : i32
    %c0_i32_0 = arith.constant 0 : i32
    %c0_i32_1 = arith.constant 0 : i32
    return %c0_i32, %c0_i32_0 : i32, i32
  }
  func.func @transform_5(%arg0: i32) -> (i32, i32) {
    %c0_i32 = arith.constant 0 : i32
    %c0_i32_0 = arith.constant 0 : i32
    %c0_i32_1 = arith.constant 0 : i32
    return %c0_i32, %c0_i32_0 : i32, i32
  }
  func.func @transform_6(%arg0: i32) -> (i32, i32) {
    %c0_i32 = arith.constant 0 : i32
    %c0_i32_0 = arith.constant 0 : i32
    %c0_i32_1 = arith.constant 0 : i32
    return %c0_i32, %c0_i32_0 : i32, i32
  }
  func.func @transform_7(%arg0: i32) -> (i32, i32) {
    %c0_i32 = arith.constant 0 : i32
    %c0_i32_0 = arith.constant 0 : i32
    %c0_i32_1 = arith.constant 0 : i32
    return %c0_i32, %c0_i32_0 : i32, i32
  }
  func.func @transform_8(%arg0: i32) -> (i32, i32) {
    %c0_i32 = arith.constant 0 : i32
    %c0_i32_0 = arith.constant 0 : i32
    %c0_i32_1 = arith.constant 0 : i32
    return %c0_i32, %c0_i32_0 : i32, i32
  }
  func.func @transform_9(%arg0: i32) -> (i32, i32) {
    %c0_i32 = arith.constant 0 : i32
    %c0_i32_0 = arith.constant 0 : i32
    %c0_i32_1 = arith.constant 0 : i32
    return %c0_i32, %c0_i32_0 : i32, i32
  }
  func.func @transform_10(%arg0: i32) -> (i32, i32) {
    %c0_i32 = arith.constant 0 : i32
    %c0_i32_0 = arith.constant 0 : i32
    %c0_i32_1 = arith.constant 0 : i32
    return %c0_i32, %c0_i32_0 : i32, i32
  }
  func.func @transform_11(%arg0: i32) -> (i32, i32) {
    %c0_i32 = arith.constant 0 : i32
    %c0_i32_0 = arith.constant 0 : i32
    %c0_i32_1 = arith.constant 0 : i32
    return %c0_i32, %c0_i32_0 : i32, i32
  }
  func.func @transform_12(%arg0: i32) -> (i32, i32) {
    %c0_i32 = arith.constant 0 : i32
    %c0_i32_0 = arith.constant 0 : i32
    %c0_i32_1 = arith.constant 0 : i32
    return %c0_i32, %c0_i32_0 : i32, i32
  }
  func.func @transform_13(%arg0: i32) -> (i32, i32) {
    %c0_i32 = arith.constant 0 : i32
    %c0_i32_0 = arith.constant 0 : i32
    return %arg0, %c0_i32 : i32, i32
  }
}

module attributes {stable_mosaic.version = 11 : i64} {
  func.func @reward_mlp_kernel(%arg0: i32, %arg1: memref<80x16xbf16, #tpu.memory_space<vmem>>, %arg2: memref<80x1xbf16, #tpu.memory_space<vmem>>, %arg3: memref<16x128xbf16, #tpu.memory_space<vmem>>, %arg4: memref<1x128xf32, #tpu.memory_space<vmem>>, %arg5: memref<1x128xf32, #tpu.memory_space<vmem>>, %arg6: memref<128x128xbf16, #tpu.memory_space<vmem>>, %arg7: memref<1x128xf32, #tpu.memory_space<vmem>>, %arg8: memref<128x128xbf16, #tpu.memory_space<vmem>>, %arg9: memref<1x128xf32, #tpu.memory_space<vmem>>, %arg10: memref<128x128xbf16, #tpu.memory_space<vmem>>, %arg11: memref<1x128xf32, #tpu.memory_space<vmem>>, %arg12: memref<128x128xbf16, #tpu.memory_space<vmem>>, %arg13: memref<1x128xf32, #tpu.memory_space<vmem>>, %arg14: memref<80x128xbf16, #tpu.memory_space<vmem>>) attributes {dimension_semantics = [#tpu.dimension_semantics<parallel>], iteration_bounds = array<i64: 2>, scalar_prefetch = 0 : i64, scratch_operands = 0 : i64, tpu.core_type = #tpu.core_type<tc>, window_params = [{transform_indices = @transform_0, window_bounds = array<i64: 80, 16>}, {transform_indices = @transform_1, window_bounds = array<i64: 80, 1>}, {pipeline_mode = #tpu.pipeline_mode<synchronous>, transform_indices = @transform_2, window_bounds = array<i64: 16, 128>}, {pipeline_mode = #tpu.pipeline_mode<synchronous>, transform_indices = @transform_3, window_bounds = array<i64: 1, 128>}, {pipeline_mode = #tpu.pipeline_mode<synchronous>, transform_indices = @transform_4, window_bounds = array<i64: 1, 128>}, {pipeline_mode = #tpu.pipeline_mode<synchronous>, transform_indices = @transform_5, window_bounds = array<i64: 128, 128>}, {pipeline_mode = #tpu.pipeline_mode<synchronous>, transform_indices = @transform_6, window_bounds = array<i64: 1, 128>}, {pipeline_mode = #tpu.pipeline_mode<synchronous>, transform_indices = @transform_7, window_bounds = array<i64: 128, 128>}, {pipeline_mode = #tpu.pipeline_mode<synchronous>, transform_indices = @transform_8, window_bounds = array<i64: 1, 128>}, {pipeline_mode = #tpu.pipeline_mode<synchronous>, transform_indices = @transform_9, window_bounds = array<i64: 128, 128>}, {pipeline_mode = #tpu.pipeline_mode<synchronous>, transform_indices = @transform_10, window_bounds = array<i64: 1, 128>}, {pipeline_mode = #tpu.pipeline_mode<synchronous>, transform_indices = @transform_11, window_bounds = array<i64: 128, 128>}, {pipeline_mode = #tpu.pipeline_mode<synchronous>, transform_indices = @transform_12, window_bounds = array<i64: 1, 128>}, {transform_indices = @transform_13, window_bounds = array<i64: 80, 128>}]} {
    %c0 = arith.constant 0 : index
    %c0_0 = arith.constant 0 : index
    %0 = vector.load %arg1[%c0, %c0_0] : memref<80x16xbf16, #tpu.memory_space<vmem>>, vector<80x16xbf16>
    %c0_1 = arith.constant 0 : index
    %c0_2 = arith.constant 0 : index
    %1 = vector.load %arg3[%c0_1, %c0_2] : memref<16x128xbf16, #tpu.memory_space<vmem>>, vector<16x128xbf16>
    %cst = arith.constant dense<0.000000e+00> : vector<80x128xf32>
    %2 = tpu.matmul %0, %1, %cst {dimension_numbers = #tpu.dot_dimension_numbers<[1], [0], [0], [1], [0, 0, 1, 1], [], []>} : vector<80x16xbf16>, vector<16x128xbf16>, vector<80x128xf32> -> vector<80x128xf32>
    %c0_3 = arith.constant 0 : index
    %c0_4 = arith.constant 0 : index
    %3 = vector.load %arg2[%c0_3, %c0_4] : memref<80x1xbf16, #tpu.memory_space<vmem>>, vector<80x1xbf16>
    %4 = arith.extf %3 : vector<80x1xbf16> to vector<80x1xf32>
    %c0_5 = arith.constant 0 : index
    %c0_6 = arith.constant 0 : index
    %5 = vector.load %arg4[%c0_5, %c0_6] : memref<1x128xf32, #tpu.memory_space<vmem>>, vector<1x128xf32>
    %6 = vector.broadcast %4 : vector<80x1xf32> to vector<80x128xf32>
    %7 = vector.broadcast %5 : vector<1x128xf32> to vector<80x128xf32>
    %8 = arith.mulf %6, %7 : vector<80x128xf32>
    %9 = arith.addf %2, %8 : vector<80x128xf32>
    %c0_7 = arith.constant 0 : index
    %c0_8 = arith.constant 0 : index
    %10 = vector.load %arg5[%c0_7, %c0_8] : memref<1x128xf32, #tpu.memory_space<vmem>>, vector<1x128xf32>
    %11 = vector.broadcast %10 : vector<1x128xf32> to vector<80x128xf32>
    %12 = arith.addf %9, %11 : vector<80x128xf32>
    %cst_9 = arith.constant 0.000000e+00 : f32
    %13 = vector.broadcast %cst_9 : f32 to vector<80x128xf32>
    %14 = arith.maximumf %12, %13 : vector<80x128xf32>
    %15 = arith.truncf %14 : vector<80x128xf32> to vector<80x128xbf16>
    %c0_10 = arith.constant 0 : index
    %c0_11 = arith.constant 0 : index
    %16 = vector.load %arg6[%c0_10, %c0_11] : memref<128x128xbf16, #tpu.memory_space<vmem>>, vector<128x128xbf16>
    %cst_12 = arith.constant dense<0.000000e+00> : vector<80x128xf32>
    %17 = tpu.matmul %15, %16, %cst_12 {dimension_numbers = #tpu.dot_dimension_numbers<[1], [0], [0], [1], [0, 0, 1, 1], [], []>} : vector<80x128xbf16>, vector<128x128xbf16>, vector<80x128xf32> -> vector<80x128xf32>
    %c0_13 = arith.constant 0 : index
    %c0_14 = arith.constant 0 : index
    %18 = vector.load %arg7[%c0_13, %c0_14] : memref<1x128xf32, #tpu.memory_space<vmem>>, vector<1x128xf32>
    %19 = vector.broadcast %18 : vector<1x128xf32> to vector<80x128xf32>
    %20 = arith.addf %17, %19 : vector<80x128xf32>
    %cst_15 = arith.constant 0.000000e+00 : f32
    %21 = vector.broadcast %cst_15 : f32 to vector<80x128xf32>
    %22 = arith.maximumf %20, %21 : vector<80x128xf32>
    %23 = arith.truncf %22 : vector<80x128xf32> to vector<80x128xbf16>
    %c0_16 = arith.constant 0 : index
    %c0_17 = arith.constant 0 : index
    %24 = vector.load %arg8[%c0_16, %c0_17] : memref<128x128xbf16, #tpu.memory_space<vmem>>, vector<128x128xbf16>
    %cst_18 = arith.constant dense<0.000000e+00> : vector<80x128xf32>
    %25 = tpu.matmul %23, %24, %cst_18 {dimension_numbers = #tpu.dot_dimension_numbers<[1], [0], [0], [1], [0, 0, 1, 1], [], []>} : vector<80x128xbf16>, vector<128x128xbf16>, vector<80x128xf32> -> vector<80x128xf32>
    %c0_19 = arith.constant 0 : index
    %c0_20 = arith.constant 0 : index
    %26 = vector.load %arg9[%c0_19, %c0_20] : memref<1x128xf32, #tpu.memory_space<vmem>>, vector<1x128xf32>
    %27 = vector.broadcast %26 : vector<1x128xf32> to vector<80x128xf32>
    %28 = arith.addf %25, %27 : vector<80x128xf32>
    %cst_21 = arith.constant 0.000000e+00 : f32
    %29 = vector.broadcast %cst_21 : f32 to vector<80x128xf32>
    %30 = arith.maximumf %28, %29 : vector<80x128xf32>
    %31 = arith.truncf %30 : vector<80x128xf32> to vector<80x128xbf16>
    %c0_22 = arith.constant 0 : index
    %c0_23 = arith.constant 0 : index
    %32 = vector.load %arg10[%c0_22, %c0_23] : memref<128x128xbf16, #tpu.memory_space<vmem>>, vector<128x128xbf16>
    %cst_24 = arith.constant dense<0.000000e+00> : vector<80x128xf32>
    %33 = tpu.matmul %31, %32, %cst_24 {dimension_numbers = #tpu.dot_dimension_numbers<[1], [0], [0], [1], [0, 0, 1, 1], [], []>} : vector<80x128xbf16>, vector<128x128xbf16>, vector<80x128xf32> -> vector<80x128xf32>
    %c0_25 = arith.constant 0 : index
    %c0_26 = arith.constant 0 : index
    %34 = vector.load %arg11[%c0_25, %c0_26] : memref<1x128xf32, #tpu.memory_space<vmem>>, vector<1x128xf32>
    %35 = vector.broadcast %34 : vector<1x128xf32> to vector<80x128xf32>
    %36 = arith.addf %33, %35 : vector<80x128xf32>
    %cst_27 = arith.constant 0.000000e+00 : f32
    %37 = vector.broadcast %cst_27 : f32 to vector<80x128xf32>
    %38 = arith.maximumf %36, %37 : vector<80x128xf32>
    %39 = arith.truncf %38 : vector<80x128xf32> to vector<80x128xbf16>
    %c0_28 = arith.constant 0 : index
    %c0_29 = arith.constant 0 : index
    %40 = vector.load %arg12[%c0_28, %c0_29] : memref<128x128xbf16, #tpu.memory_space<vmem>>, vector<128x128xbf16>
    %cst_30 = arith.constant dense<0.000000e+00> : vector<80x128xf32>
    %41 = tpu.matmul %39, %40, %cst_30 {dimension_numbers = #tpu.dot_dimension_numbers<[1], [0], [0], [1], [0, 0, 1, 1], [], []>} : vector<80x128xbf16>, vector<128x128xbf16>, vector<80x128xf32> -> vector<80x128xf32>
    %c0_31 = arith.constant 0 : index
    %c0_32 = arith.constant 0 : index
    %42 = vector.load %arg13[%c0_31, %c0_32] : memref<1x128xf32, #tpu.memory_space<vmem>>, vector<1x128xf32>
    %43 = vector.broadcast %42 : vector<1x128xf32> to vector<80x128xf32>
    %44 = arith.addf %41, %43 : vector<80x128xf32>
    %45 = arith.truncf %44 : vector<80x128xf32> to vector<80x128xbf16>
    %c0_33 = arith.constant 0 : index
    %c0_34 = arith.constant 0 : index
    %46 = vector.load %arg14[%c0_33, %c0_34] : memref<80x128xbf16, #tpu.memory_space<vmem>>, vector<80x128xbf16>
    tpu.vector_store %arg14[%c0_33, %c0_34], %45 {strides = array<i32>} : memref<80x128xbf16, #tpu.memory_space<vmem>>, vector<80x128xbf16>,
    return
  }
  func.func @transform_0(%arg0: i32) -> (i32, i32) {
    %c0_i32 = arith.constant 0 : i32
    %c0_i32_0 = arith.constant 0 : i32
    return %arg0, %c0_i32 : i32, i32
  }
  func.func @transform_1(%arg0: i32) -> (i32, i32) {
    %c0_i32 = arith.constant 0 : i32
    %c0_i32_0 = arith.constant 0 : i32
    return %arg0, %c0_i32 : i32, i32
  }
  func.func @transform_2(%arg0: i32) -> (i32, i32) {
    %c0_i32 = arith.constant 0 : i32
    %c0_i32_0 = arith.constant 0 : i32
    %c0_i32_1 = arith.constant 0 : i32
    return %c0_i32, %c0_i32_0 : i32, i32
  }
  func.func @transform_3(%arg0: i32) -> (i32, i32) {
    %c0_i32 = arith.constant 0 : i32
    %c0_i32_0 = arith.constant 0 : i32
    %c0_i32_1 = arith.constant 0 : i32
    return %c0_i32, %c0_i32_0 : i32, i32
  }
  func.func @transform_4(%arg0: i32) -> (i32, i32) {
    %c0_i32 = arith.constant 0 : i32
    %c0_i32_0 = arith.constant 0 : i32
    %c0_i32_1 = arith.constant 0 : i32
    return %c0_i32, %c0_i32_0 : i32, i32
  }
  func.func @transform_5(%arg0: i32) -> (i32, i32) {
    %c0_i32 = arith.constant 0 : i32
    %c0_i32_0 = arith.constant 0 : i32
    %c0_i32_1 = arith.constant 0 : i32
    return %c0_i32, %c0_i32_0 : i32, i32
  }
  func.func @transform_6(%arg0: i32) -> (i32, i32) {
    %c0_i32 = arith.constant 0 : i32
    %c0_i32_0 = arith.constant 0 : i32
    %c0_i32_1 = arith.constant 0 : i32
    return %c0_i32, %c0_i32_0 : i32, i32
  }
  func.func @transform_7(%arg0: i32) -> (i32, i32) {
    %c0_i32 = arith.constant 0 : i32
    %c0_i32_0 = arith.constant 0 : i32
    %c0_i32_1 = arith.constant 0 : i32
    return %c0_i32, %c0_i32_0 : i32, i32
  }
  func.func @transform_8(%arg0: i32) -> (i32, i32) {
    %c0_i32 = arith.constant 0 : i32
    %c0_i32_0 = arith.constant 0 : i32
    %c0_i32_1 = arith.constant 0 : i32
    return %c0_i32, %c0_i32_0 : i32, i32
  }
  func.func @transform_9(%arg0: i32) -> (i32, i32) {
    %c0_i32 = arith.constant 0 : i32
    %c0_i32_0 = arith.constant 0 : i32
    %c0_i32_1 = arith.constant 0 : i32
    return %c0_i32, %c0_i32_0 : i32, i32
  }
  func.func @transform_10(%arg0: i32) -> (i32, i32) {
    %c0_i32 = arith.constant 0 : i32
    %c0_i32_0 = arith.constant 0 : i32
    %c0_i32_1 = arith.constant 0 : i32
    return %c0_i32, %c0_i32_0 : i32, i32
  }
  func.func @transform_11(%arg0: i32) -> (i32, i32) {
    %c0_i32 = arith.constant 0 : i32
    %c0_i32_0 = arith.constant 0 : i32
    %c0_i32_1 = arith.constant 0 : i32
    return %c0_i32, %c0_i32_0 : i32, i32
  }
  func.func @transform_12(%arg0: i32) -> (i32, i32) {
    %c0_i32 = arith.constant 0 : i32
    %c0_i32_0 = arith.constant 0 : i32
    %c0_i32_1 = arith.constant 0 : i32
    return %c0_i32, %c0_i32_0 : i32, i32
  }
  func.func @transform_13(%arg0: i32) -> (i32, i32) {
    %c0_i32 = arith.constant 0 : i32
    %c0_i32_0 = arith.constant 0 : i32
    return %arg0, %c0_i32 : i32, i32
  }
}

</mosaic_0001>

<bundles_post_ra>
// kernel: tpu_custom_call.1
= control target key start
LH: loop header
LB: loop body
LE: loop exit
PB: predicated region body
PF: predicated region fallthrough
CT: control target
= control target key end

     0   :  { %s2709_s0 = inlined_call_operand.vmem [shape: bf16[160,16], index: 0, kind: input, shape index: {}]   ;;  %s2710_s1 = inlined_call_operand.vmem [shape: bf16[160,1], index: 1, kind: input, shape index: {}]   ;;  %s2711_s2 = inlined_call_operand.hbm [shape: bf16[16,128], index: 2, kind: input, shape index: {}]   ;;  %s2712_s3 = inlined_call_operand.vmem [shape: f32[1,128], index: 3, kind: input, shape index: {}]   ;;  %s2713_s4 = inlined_call_operand.hbm [shape: f32[1,128], index: 4, kind: input, shape index: {}]   ;;  %s2714_s5 = inlined_call_operand.vmem [shape: bf16[128,128], index: 5, kind: input, shape index: {}]   ;;  %s2715_s6 = inlined_call_operand.vmem [shape: f32[1,128], index: 6, kind: input, shape index: {}]   ;;  %s2716_s7 = inlined_call_operand.vmem [shape: bf16[128,128], index: 7, kind: input, shape index: {}]   ;;  %s2717_s8 = inlined_call_operand.vmem [shape: f32[1,128], index: 8, kind: input, shape index: {}]   ;;  %s2718_s9 = inlined_call_operand.vmem [shape: bf16[128,128], index: 9, kind: input, shape index: {}]   ;;  %s2719_s10 = inlined_call_operand.vmem [shape: f32[1,128], index: 10, kind: input, shape index: {}]   ;;  %s2720_s11 = inlined_call_operand.hbm [shape: bf16[128,128], index: 11, kind: input, shape index: {}]   ;;  %s2721_s12 = inlined_call_operand.vmem [shape: f32[1,128], index: 12, kind: input, shape index: {}]   ;;  %s2722_s13 = inlined_call_operand.hbm [shape: bf16[160,128], index: 13, kind: output, shape index: {}]  }
   0x1   :  { %2733 = sst [smem:[#allocation18_spill]] %s2713_s4 }
   0x2   :  { %2734 = sst [smem:[#allocation19_spill]] %s2722_s13 }
   0x3   :  { %18 = vsyncpa [#allocation3], 0 }
   0x4   :  { %19 = vsyncpa [#allocation6], 0 }
   0x5   :  { %20 = vsyncpa [#allocation4], 0 }
   0x6   :  { %22 = vsyncpa [#allocation4 + $0x1], 0  ;;  %s2292_s25 = smov 0   ;;  %s2294_s26 = smov 0  }
   0x7   :  { %s2296_s27 = smov 0   ;;  %s2298_s28 = smov 0  }
   0x8 LB: > { %2735 = sst [smem:[#allocation12_spill]] %s2197_s25  ;;  %s2313_s29 = sadd.s32 4294967295, %s2209_s28   ;;  %s2209_s28 = sphi %s2298_s28, %s2758_s28   ;;  %s2205_s27 = sphi %s2296_s27, %s2760_s27   ;;  %s2201_s26 = sphi %s2294_s26, %s2762_s26   ;;  %s2197_s25 = sphi %s2292_s25, %s2761_s25  }
   0x9   : > { %2736 = sst [smem:[#allocation13_spill]] %s2205_s27  ;;  %s1548_s30 = sadd.s32 4294967294, %s2209_s28  }
   0xa   : > { %2737 = sst [smem:[#allocation14_spill]] %s2209_s28  ;;  %s2317_s14 = sadd.s32 1, %s2209_s28  }
   0xb   : > { %2738 = sst [smem:[#allocation15_spill]] %s2317_s14  ;;  %s318_s15 = sadd.s32 1, %s2205_s27 }
   0xc   : > { %s315_s16 = ssub.s32 %s2209_s28, %s2317_s14  ;;  %p328_p0 = scmp.ne.s32.totalorder %s2205_s27, %s2201_s26 }
   0xd   : > { %p316_p1 = scmp.eq.s32.totalorder %s315_s16, 0  ;;  %p329_p2 = scmp.eq.s32.totalorder %s2313_s29, 1 }
   0xe   : > { %p334_p3 = scmp.ne.s32.totalorder %s2201_s26, %s2197_s25  ;;  %p335_p4 = scmp.eq.s32.totalorder %s1548_s30, 1 }
   0xf   : > { %s2328_s17 = scalar_select %p316_p1, %s2205_s27, %s318_s15  }
  0x10   : > { %p2330_p5 = por %p329_p2, %p328_p0  ;;  %p2334_p6 = por %p335_p4, %p334_p3 }
  0x11   : > { %2739 = sst [smem:[#allocation16_spill]] %s2328_s17  ;;  %p1549_p7 = scmp.ge.s32.totalorder %s2209_s28, 1 }
  0x12   : > { %s2740_s18 = scalar_select %p2330_p5, 1, 0 }
  0x13   : > { %s2741_s19 = scalar_select %p2334_p6, 1, 0 }
  0x14   : > { %p342_p8 = scmp.lt.s32.totalorder %s2209_s28, 3  ;;  %p2728_p9 = scmp.eq.s32.totalorder %s2313_s29, 0 }
  0x15   : > { %2742 = sst [smem:[#allocation17_spill]] %s2741_s19  ;;  %s2211_s21 = smov [#allocation5]  }
  0x16   : > { %p2341_p10 = pnand %p1549_p7, %p342_p8  ;;  %s371_s22 = sshll.u32 %s2211_s21, 4  ;;  %s372_s22 = int_to_ptr.vmem [resolvable:$true] %s371_s22 }
  0x17   : > { %s2212_s23 = smov [#allocation2]   ;;  %s2213_s15 = smov [#allocation7]  }
  0x18   : > { %s2743_s20 = scalar_select %p2341_p10, 1, 0 }
  0x19   : > { %p1927_p11 = pneg %p2341_p10  ;;  %s354_s24 = sshll.u32 %s2212_s23, 4  ;;  %s2353_s24 = int_to_ptr.vmem [resolvable:$true] %s354_s24 }
  0x1a   : > { %s2355_s16 = sshll.u32 %s2213_s15, 4  ;;  %s2745_s4 = sld [smem:[#allocation18_spill]]  ;;  %s400_s16 = int_to_ptr.vmem [resolvable:$true] %s2355_s16 }
  0x1b   : > { %p2349_p12 = pnand %p2728_p9, %p1927_p11 }
  0x1d   : > { %p2365_p0 = pneg %p2349_p12 }
  0x20   : > { %s2055_s21 = scalar_lea.hbm %s2745_s4, 16 }
  0x21   : > { %p2056_p13 = scmp.ne.s32.totalorder %s2745_s4, %s2055_s21  ;;  %p2062_p3 = scmp.lt.u32.totalorder %s2055_s21, %s2745_s4 }
  0x23   : > { %p2058_p1 = pnand %p2365_p0, %p2056_p13 }
  0x25   : > { %p2059_p2 = pneg %p2058_p1 }
  0x27   : > { %p2064_p4 = pnand %p2062_p3, %p2059_p2 }
  0x29   : > { %2067 = shalt.err (!%p2064_p4)
}
  0x2a   : > { %s2068_s27 = scalar_lea.vmem %s372_s22, 16  ;;  %s2075_s14 = scalar_lea.vmem %s372_s22, 32 }
  0x2b   : > { %p2069_p7 = scmp.ne.s32.totalorder %s372_s22, %s2068_s27  ;;  %p2076_p9 = scmp.lt.s32.totalorder %s372_s22, %s372_s22 }
  0x2c   : > { %p2077_p6 = scmp.lt.s32.totalorder %s2075_s14, %s2068_s27 }
  0x2d   : > { %p2071_p8 = pnand %p2069_p7, %p2365_p0 }
  0x2e   : > { %p2078_p5 = por %p2077_p6, %p2076_p9 }
  0x2f   : > { %p2072_p11 = pneg %p2071_p8 }
  0x31   : > { %p2079_p10 = pnand %p2078_p5, %p2072_p11 }
  0x33   : > { %2082 = shalt.err (!%p2079_p10)
}
  0x34   : > { %1933 = dma.hbm_to_vmem [thread:$0]  (!%p2349_p12), %s2745_s4, 16, %s372_s22, [#allocation6]  }
  0x35   : > { %s2083_s15 = scalar_lea.hbm %s2711_s2, 128 }
  0x36   : > { %p2084_p13 = scmp.ne.s32.totalorder %s2711_s2, %s2083_s15  ;;  %p2090_p5 = scmp.lt.u32.totalorder %s2083_s15, %s2711_s2 }
  0x38   : > { %p2086_p1 = pnand %p2084_p13, %p2365_p0 }
  0x3a   : > { %p2087_p6 = pneg %p2086_p1 }
  0x3c   : > { %p2092_p9 = pnand %p2090_p5, %p2087_p6 }
  0x3e   : > { %2095 = shalt.err (!%p2092_p9)
}
  0x3f   : > { %s2096_s22 = scalar_lea.vmem %s2353_s24, 128  ;;  %p2104_p4 = scmp.lt.s32.totalorder %s2353_s24, %s2353_s24 }
  0x40   : > { %p2097_p10 = scmp.ne.s32.totalorder %s2353_s24, %s2096_s22  ;;  %p2105_p7 = scmp.lt.s32.totalorder %s2096_s22, %s2096_s22 }
  0x42   : > { %p2099_p2 = pnand %p2097_p10, %p2365_p0  ;;  %p2106_p8 = por %p2105_p7, %p2104_p4 }
  0x44   : > { %p2100_p3 = pneg %p2099_p2 }
  0x46   : > { %p2107_p11 = pnand %p2106_p8, %p2100_p3 }
  0x48   : > { %2110 = shalt.err (!%p2107_p11)
}
  0x49   : > { %s2214_s13 = smov 64   ;;  %s2215_s28 = smov 4  }
  0x4a   : > { %1930 = dma.hbm_to_vmem [thread:$0]  (!%p2349_p12), %s2711_s2, 128, %s2353_s24, [#allocation3], %s2214_s13, %s2214_s13, %s2215_s28  }
  0x4b   : > { %s2111_s15 = scalar_lea.hbm %s2720_s11, 1024 }
  0x4c   : > { %p2112_p13 = scmp.ne.s32.totalorder %s2720_s11, %s2111_s15  ;;  %p2118_p5 = scmp.lt.u32.totalorder %s2111_s15, %s2720_s11 }
  0x4e   : > { %p2114_p1 = pnand %p2112_p13, %p2365_p0 }
  0x50   : > { %p2115_p6 = pneg %p2114_p1 }
  0x52   : > { %p2120_p9 = pnand %p2118_p5, %p2115_p6 }
  0x54   : > { %2123 = shalt.err (!%p2120_p9)
}
  0x55   : > { %s2124_s17 = scalar_lea.vmem %s400_s16, 1024  ;;  %p2132_p4 = scmp.lt.s32.totalorder %s400_s16, %s400_s16 }
  0x56   : > { %p2125_p10 = scmp.ne.s32.totalorder %s400_s16, %s2124_s17  ;;  %p2133_p7 = scmp.lt.s32.totalorder %s2124_s17, %s2124_s17 }
  0x58   : > { %p2127_p2 = pnand %p2125_p10, %p2365_p0  ;;  %p2134_p8 = por %p2133_p7, %p2132_p4 }
  0x5a   : > { %p2128_p3 = pneg %p2127_p2 }
  0x5c   : > { %p2135_p11 = pnand %p2134_p8, %p2128_p3 }
  0x5e   : > { %2138 = shalt.err (!%p2135_p11)
}
  0x5f   : > { %1936 = dma.hbm_to_vmem [thread:$0]  (!%p2349_p12), %s2720_s11, 1024, %s400_s16, [#allocation6], %s2214_s13, %s2214_s13, %s2215_s28  }
  0x60   : > { %p2747_p13 = scmp.ne.s32.totalorder %s2743_s20, 0 }
  0x61   : > { %p2748_p1 = scmp.eq.s32.totalorder (!%p2747_p13), %s2313_s29, 0 }
  0x62   : > { %436 = sbr.rel (%p2747_p13) target bundleno = 1265 (0x4f1), region = 72 }
  0x69   : > { %2184 = dma.done.wait (%p2748_p1), [#allocation3], 128   ;;  %p2749_p0 = pmov %p2748_p1 }
  0x6b   : > { %2186 = vsyncadd (%p2749_p0), [#allocation3], 4294967168  ;;  %p2750_p6 = pmov %p2749_p0 }
  0x6c   : > { %p2751_p5 = pmov %p2749_p0 }
  0x6d   : > { %2188 = dma.done.wait (%p2750_p6), [#allocation6], 1040  }
  0x6e   : > { %2190 = vsyncadd (%p2751_p5), [#allocation6], 4294966256  ;;  %s493_s4 = smul.u32 10, %s2313_s29  ;;  %v2216_v0 = vmov 0.0   ;;  %vm2217_vm0 = vmmov 0   ;;  %v2218_v1 = vmov 0  }
  0x6f   : > { %1744 = vmatprep.subr.bf16.mxu0 %v2216_v0  ;;  %1910 = vmatprep.subr.bf16.mxu1 %v2216_v0  ;;  %v2017_v2 = vld [vmem:[#allocation2] sm:$0xff]   ;;  %vm637_vm1 = vcmask 130048   ;;  %v2023_v16 = vld [vmem:[%s2714_s5] sm:$0xff]   ;;  %v2024_v22 = vld [vmem:[%s2714_s5 + $0x8] sm:$0xff]   ;;  %s1632_s28 = smul.u32 640, %s2313_s29  ;;  %s2752_s15 = sld [smem:[#allocation19_spill]] }
  0x70   : > { %1746 = vmatprep.mubr.msk.bf16.mxu0 %vm2217_vm0, %v2216_v0  ;;  %1762 = vmatprep.mubr.msk.bf16.mxu1 %vm2217_vm0, %v2216_v0  ;;  %p494_p12 = scmp.lt.s32.totalorder %s493_s4, 19  ;;  %v2025_v27 = vld [vmem:[%s2714_s5 + $0x10] sm:$0xff]   ;;  %v2026_v30 = vld [vmem:[%s2714_s5 + $0x18] sm:$0xff]   ;;  %v2027_v31 = vld [vmem:[%s2714_s5 + $0x20] sm:$0xff]   ;;  %p2753_p10 = scmp.ne.s32.totalorder %s2740_s18, 0 }
  0x71   : > { %1990 = vset.pattern.permute.xlu0 %v2218_v1  ;;  %2001 = vset.pattern.permute.xlu1 %v2218_v1  ;;  %v2028_v33 = vld [vmem:[%s2714_s5 + $0x28] sm:$0xff]   ;;  %v2029_v34 = vld [vmem:[%s2714_s5 + $0x30] sm:$0xff]   ;;  %v2030_v35 = vld [vmem:[%s2714_s5 + $0x38] sm:$0xff]   ;;  %s2219_s22 = smov [#allocation8]  }
  0x72   : > { %s2764_s4 = smov (!%p494_p12, %s493_s4), 19  ;;  %1745 = vmatpush3.bf16.msra.mxu0 %v2017_v2  ;;  %1911 = vmatpush3.bf16.msra.mxu1 %v2017_v2  ;;  %v2031_v36 = vld [vmem:[%s2716_s7] sm:$0xff]   ;;  %v2032_v37 = vld [vmem:[%s2716_s7 + $0x8] sm:$0xff]   ;;  %v2033_v38 = vld [vmem:[%s2716_s7 + $0x10] sm:$0xff]   ;;  %s2143_s17 = sshll.u32 %s2219_s22, 4  ;;  %s2144_s17 = int_to_ptr.vmem [resolvable:$false] %s2143_s17 }
  0x73   : > { %s1558_s20 = sshll.u32 %s2764_s4, 2  ;;  %1766 = vmatprep.subr.bf16.mxu1 %v2216_v0  ;;  %1802 = vmatprep.subr.bf16.mxu0 %v2216_v0  ;;  %v2034_v39 = vld [vmem:[%s2716_s7 + $0x18] sm:$0xff]   ;;  %v2035_v40 = vld [vmem:[%s2716_s7 + $0x20] sm:$0xff]   ;;  %v2036_v41 = vld [vmem:[%s2716_s7 + $0x28] sm:$0xff]   ;;  %s490_s4 = sand.u32 1, %s2201_s26  }
  0x74   : > { %s2443_s23 = scalar_lea.vmem %s2709_s0, %s1558_s20  ;;  %s503_s25 = scalar_lea.vmem %s2710_s1, %s1558_s20  ;;  %v2529_v47 = vld [vmem:[%s2712_s3] ss:$0 sm:$0xff]  ;;  %v2535_v55 = vld [vmem:[#allocation5] ss:$0 sm:$0xff] }
  0x75   : > { %v2018_v3 = vld [vmem:[%s2443_s23] sm:$0xff]   ;;  %v1678_v6 = vld [vmem:[%s503_s25 + $0x8] sm:$0xff]   ;;  %v1679_v12 = vld [vmem:[%s503_s25 + $0x10] sm:$0xff]   ;;  %s1912_s16 = smul.u32 40, %s490_s4  ;;  %s2663_s27 = scalar_lea.hbm %s2752_s15, %s1632_s28 }
  0x76   : > { %v2019_v4 = vld [vmem:[%s2443_s23 + $0x20] sm:$0xff]   ;;  %1747 = vmatmul.mubr.msk.bf16.vlgmr.msra.gmra.mrb[0].mxu0 %vm637_vm1, %v2018_v3  ;;  %v1639_v10 = vunpack.c.l.bf16 %v1678_v6  ;;  %v1640_v11 = vunpack.c.h.bf16 %v1678_v6  ;;  %v1680_v13 = vld [vmem:[%s503_s25 + $0x18] sm:$0xff]   ;;  %v1643_v14 = vunpack.c.l.bf16 %v1679_v12  ;;  %v1644_v15 = vunpack.c.h.bf16 %v1679_v12  ;;  %v2020_v17 = vld [vmem:[%s2443_s23 + $0x8] sm:$0xff]   ;;  %s2668_s29 = scalar_lea.sflag [#allocation4], %s490_s4  ;;  %s2145_s24 = scalar_lea.vmem %s2144_s17, 1280 }
  0x77   : > { %1763 = vmatmul.mubr.msk.bf16.vlgmr.msra.gmra.mrb[0].mxu1 %vm637_vm1, %v2019_v4  ;;  %1750 = vmatprep.mubr.msk.bf16.mxu0 %vm2217_vm0, %v2216_v0  ;;  %v1634_v5 = vld [vmem:[%s503_s25] sm:$0xff]   ;;  %v1647_v19 = vunpack.c.l.bf16 %v1680_v13  ;;  %v1648_v20 = vunpack.c.h.bf16 %v1680_v13  ;;  %v2021_v28 = vld [vmem:[%s2443_s23 + $0x10] sm:$0xff]   ;;  %v2022_v32 = vld [vmem:[%s2443_s23 + $0x18] sm:$0xff]   ;;  %s2650_s13 = scalar_lea.vmem [#allocation8], %s1912_s16 }
  0x78   : > { %v1681_v7 = vld [vmem:[%s503_s25 + $0x20] sm:$0xff]   ;;  %1782 = vmatprep.mubr.msk.bf16.mxu1 %vm2217_vm0, %v2216_v0  ;;  %v1635_v8 = vunpack.c.l.bf16 %v1634_v5  ;;  %v1636_v9 = vunpack.c.h.bf16 %v1634_v5  ;;  %v2002_v21 = vpack.i.bf16 %v1644_v15, %v1643_v14  ;;  %1767 = vmatpush3.bf16.msra.mxu1 %v2023_v16  ;;  %v1996_v23 = vpack.i.bf16 %v1640_v11, %v1639_v10  ;;  %s1443_s23 = sshll.u32 %s2650_s13, 4  ;;  %s2658_s23 = int_to_ptr.vmem [resolvable:$true] %s1443_s23 }
  0x79   : > { %v1651_v24 = vunpack.c.l.bf16 %v1681_v7  ;;  %v1652_v25 = vunpack.c.h.bf16 %v1681_v7  ;;  %1768 = vmatprep.subr.bf16.mxu1 %v2216_v0  ;;  %v2007_v26 = vpack.i.bf16 %v1648_v20, %v1647_v19  ;;  %1803 = vmatpush3.bf16.msra.mxu0 %v2031_v36  ;;  %s2139_s14 = scalar_lea.vmem %s2658_s23, 640  ;;  %p2146_p4 = scmp.lt.s32.totalorder %s2658_s23, %s2144_s17 }
  0x7a   : > { %v1991_v18 = vpack.i.bf16 %v1636_v9, %v1635_v8  ;;  %2003 = vperm.xlu1 %2001, %v2002_v21   ;;  %1804 = vmatprep.subr.bf16.mxu0 %v2216_v0  ;;  %p2140_p9 = scmp.ne.s32.totalorder %s2658_s23, %s2139_s14  ;;  %p2147_p7 = scmp.lt.s32.totalorder %s2145_s24, %s2139_s14 }
  0x7b   : > { %v2012_v29 = vpack.i.bf16 %v1652_v25, %v1651_v24 }
  0x7c   : > { %1992 = vperm.xlu0 %1990, %v1991_v18   ;;  %1769 = vmatpush3.bf16.msra.mxu1 %v2024_v22  ;;  %p2141_p2 = pnand %p2140_p9, %p2753_p10  ;;  %p2148_p8 = por %p2147_p7, %p2146_p4 }
  0x7d   : > { %1770 = vmatprep.subr.bf16.mxu1 %v2216_v0  ;;  %1805 = vmatpush3.bf16.msra.mxu0 %v2032_v37 }
  0x7e   : > { %1751 = vmatmul.mubr.msk.bf16.gmra.mrb[4].mxu0 %vm637_vm1, %v2020_v17  ;;  %2008 = vperm.xlu1 %2001, %v2007_v26   ;;  %p2142_p3 = pneg %p2141_p2 }
  0x7f   : > { %1754 = vmatprep.mubr.msk.bf16.mxu0 %vm2217_vm0, %v2216_v0  ;;  %1806 = vmatprep.subr.bf16.mxu0 %v2216_v0 }
  0x80   : > { %1997 = vperm.xlu0 %1990, %v1996_v23   ;;  %1771 = vmatpush3.bf16.msra.mxu1 %v2025_v27  ;;  %p2149_p11 = pnand %p2148_p8, %p2142_p3 }
  0x81   : > { %1772 = vmatprep.subr.bf16.mxu1 %v2216_v0  ;;  %1807 = vmatpush3.bf16.msra.mxu0 %v2033_v38 }
  0x82   : > { %1808 = vmatprep.subr.bf16.mxu0 %v2216_v0 }
  0x84   : > { %2013 = vperm.xlu0 %1990, %v2012_v29   ;;  %1773 = vmatpush3.bf16.msra.mxu1 %v2026_v30 }
  0x85   : > { %1774 = vmatprep.subr.bf16.mxu1 %v2216_v0  ;;  %1809 = vmatpush3.bf16.msra.mxu0 %v2034_v39 }
  0x86   : > { %1755 = vmatmul.mubr.msk.bf16.gmra.mrb[8].mxu0 %vm637_vm1, %v2021_v28  ;;  %1810 = vmatprep.subr.bf16.mxu0 %v2216_v0 }
  0x87   : > { %1758 = vmatprep.mubr.msk.bf16.mxu0 %vm2217_vm0, %v2216_v0 }
  0x88   : > { %1775 = vmatpush3.bf16.msra.mxu1 %v2027_v31 }
  0x89   : > { %1776 = vmatprep.subr.bf16.mxu1 %v2216_v0  ;;  %1811 = vmatpush3.bf16.msra.mxu0 %v2035_v40 }
  0x8a   : > { %1812 = vmatprep.subr.bf16.mxu0 %v2216_v0 }
  0x8c   : > { %1777 = vmatpush3.bf16.msra.mxu1 %v2028_v33 }
  0x8d   : > { %1778 = vmatprep.subr.bf16.mxu1 %v2216_v0  ;;  %1813 = vmatpush3.bf16.msra.mxu0 %v2036_v41 }
  0x8e   : > { %1759 = vmatmul.mubr.msk.bf16.gmra.mrb[12].mxu0 %vm637_vm1, %v2022_v32  ;;  %1814 = vmatprep.subr.bf16.mxu0 %v2216_v0 }
  0x8f   : > { %1818 = vmatprep.mubr.msk.bf16.mxu0 %vm2217_vm0, %v2216_v0 }
  0x90   : > { %1779 = vmatpush3.bf16.msra.mxu1 %v2029_v34 }
  0x91   : > { %1780 = vmatprep.subr.bf16.mxu1 %v2216_v0 }
  0x94   : > { %1781 = vmatpush3.bf16.msra.mxu1 %v2030_v35 }
  0x95   : > { %1838 = vmatprep.subr.bf16.mxu1 %v2216_v0 }
  0xf9   : > { %v2004_v15 = vpop.permute.xlu1 %2003 }
  0xfa   : > { %v2005_v17 = vunpack.i.l.bf16 %v2004_v15  ;;  %v2006_v25 = vunpack.i.h.bf16 %v2004_v15 }
  0xfb   : > { %v1993_v42 = vpop.permute.xlu0 %1992 }
  0xfc   : > { %v1994_v45 = vunpack.i.l.bf16 %v1993_v42  ;;  %v1995_v48 = vunpack.i.h.bf16 %v1993_v42  ;;  %v600_v29 = vmul.f32 %v2005_v17, %v2529_v47  ;;  %v601_v32 = vmul.f32 %v2006_v25, %v2529_v47 }
  0xfd   : > { %v2009_v33 = vpop.permute.xlu1 %2008 }
  0xfe   : > { %v596_v50 = vmul.f32 %v1994_v45, %v2529_v47  ;;  %v597_v52 = vmul.f32 %v1995_v48, %v2529_v47  ;;  %v2010_v39 = vunpack.i.l.bf16 %v2009_v33 }
  0xff   : > { %v1998_v43 = vpop.permute.xlu0 %1997 }
 0x100   : > { %v1999_v61 = vunpack.i.l.bf16 %v1998_v43  ;;  %v2000_v7 = vunpack.i.h.bf16 %v1998_v43  ;;  %v2011_v43 = vunpack.i.h.bf16 %v2009_v33  ;;  %v602_v48 = vmul.f32 %v2010_v39, %v2529_v47 }
 0x102   : > { %v598_v14 = vmul.f32 %v1999_v61, %v2529_v47  ;;  %v599_v21 = vmul.f32 %v2000_v7, %v2529_v47  ;;  %v1573_v7 = vld [vmem:[%s2715_s6] ss:$0 sm:$0xff] }
 0x103   : > { %v2014_v44 = vpop.permute.xlu0 %2013 }
 0x104   : > { %v2015_v46 = vunpack.i.l.bf16 %v2014_v44  ;;  %v2016_v49 = vunpack.i.h.bf16 %v2014_v44 }
 0x106   : > { %v604_v51 = vmul.f32 %v2015_v46, %v2529_v47  ;;  %v605_v53 = vmul.f32 %v2016_v49, %v2529_v47 }
 0x149   : > { %v687_v54 = vpop.f32.mrb[0].mxu0 }
 0x14a   : > { %v719_v56 = vpop.f32.mrb[0].mxu1  ;;  %v688_v57 = vadd.f32 %v687_v54, %v596_v50  ;;  %v1748_v59 = vpop.f32.mrb[1].mxu0 }
 0x14b   : > { %v720_v58 = vadd.f32 %v719_v56, %v604_v51  ;;  %v1764_v60 = vpop.f32.mrb[1].mxu1  ;;  %v690_v62 = vpop.f32.mrb[2].mxu0 }
 0x14c   : > { %v722_v63 = vpop.f32.mrb[2].mxu1  ;;  %v733_v1 = vadd.f32 %v2535_v55, %v688_v57  ;;  %v691_v3 = vadd.f32 %v690_v62, %v597_v52  ;;  %v1749_v5 = vpop.f32.mrb[3].mxu0  ;;  %v603_v52 = vmul.f32 %v2011_v43, %v2529_v47  ;;  %v2037_v47 = vld [vmem:[%s2716_s7 + $0x30] sm:$0xff]  }
 0x14d   : > { %v741_v2 = vadd.f32 %v2535_v55, %v720_v58  ;;  %v723_v4 = vadd.f32 %v722_v63, %v605_v53  ;;  %v1765_v6 = vpop.f32.mrb[3].mxu1  ;;  %1815 = vmatpush3.bf16.msra.mxu0 %v2037_v47  ;;  %v2039_v63 = vld [vmem:[%s2718_s9] sm:$0xff]   ;;  %v2044_v5 = vld [vmem:[%s2718_s9 + $0x28] sm:$0xff]  }
 0x14e   : > { %v734_v9 = vadd.f32 %v2535_v55, %v691_v3  ;;  %v743_v11 = vmax.f32 %v733_v1, 0.0  ;;  %1816 = vmatprep.subr.bf16.mxu0 %v2216_v0  ;;  %v2040_v1 = vld [vmem:[%s2718_s9 + $0x8] sm:$0xff]   ;;  %v2042_v3 = vld [vmem:[%s2718_s9 + $0x18] sm:$0xff]   ;;  %v2045_v6 = vld [vmem:[%s2718_s9 + $0x30] sm:$0xff]  }
 0x14f   : > { %v751_v8 = vmax.f32 %v741_v2, 0.0  ;;  %v742_v10 = vadd.f32 %v2535_v55, %v723_v4  ;;  %v2041_v2 = vld [vmem:[%s2718_s9 + $0x10] sm:$0xff]   ;;  %v2043_v4 = vld [vmem:[%s2718_s9 + $0x20] sm:$0xff]  }
 0x150   : > { %v744_v12 = vmax.f32 %v734_v9, 0.0  ;;  %v1582_v47 = vld [vmem:[%s2717_s8] ss:$0 sm:$0xff] }
 0x151   : > { %v752_v13 = vmax.f32 %v742_v10, 0.0  ;;  %v695_v16 = vpop.f32.mrb[4].mxu0 }
 0x152   : > { %v753_v18 = vpack.c.bf16 %v744_v12, %v743_v11  ;;  %v696_v19 = vadd.f32 %v695_v16, %v598_v14  ;;  %v1752_v20 = vpop.f32.mrb[5].mxu0 }
 0x153   : > { %v757_v22 = vpack.c.bf16 %v752_v13, %v751_v8  ;;  %v698_v23 = vpop.f32.mrb[6].mxu0 }
 0x154   : > { %v735_v24 = vadd.f32 %v2535_v55, %v696_v19  ;;  %v699_v26 = vadd.f32 %v698_v23, %v599_v21  ;;  %v1753_v27 = vpop.f32.mrb[7].mxu0  ;;  %1783 = vmatmul.mubr.bf16.vlgmr.msra.gmra.mrb[4].mxu1 %v753_v18 }
 0x155   : > { %1786 = vmatprep.mubr.msk.bf16.mxu1 %vm2217_vm0, %v2216_v0  ;;  %1839 = vmatpush3.bf16.msra.mxu1 %v2039_v63 }
 0x156   : > { %v736_v28 = vadd.f32 %v2535_v55, %v699_v26  ;;  %v745_v30 = vmax.f32 %v735_v24, 0.0  ;;  %1840 = vmatprep.subr.bf16.mxu1 %v2216_v0 }
 0x158   : > { %v746_v31 = vmax.f32 %v736_v28, 0.0 }
 0x159   : > { %v703_v34 = vpop.f32.mrb[8].mxu0  ;;  %1841 = vmatpush3.bf16.msra.mxu1 %v2040_v1 }
 0x15a   : > { %v704_v35 = vadd.f32 %v703_v34, %v600_v29  ;;  %v1756_v36 = vpop.f32.mrb[9].mxu0  ;;  %v754_v37 = vpack.c.bf16 %v746_v31, %v745_v30  ;;  %1842 = vmatprep.subr.bf16.mxu1 %v2216_v0 }
 0x15b   : > { %v706_v38 = vpop.f32.mrb[10].mxu0 }
 0x15c   : > { %v737_v40 = vadd.f32 %v2535_v55, %v704_v35  ;;  %v707_v41 = vadd.f32 %v706_v38, %v601_v32  ;;  %v1757_v42 = vpop.f32.mrb[11].mxu0  ;;  %1787 = vmatmul.mubr.bf16.gmra.mrb[8].mxu1 %v754_v37 }
 0x15d   : > { %1790 = vmatprep.mubr.msk.bf16.mxu1 %vm2217_vm0, %v2216_v0  ;;  %1843 = vmatpush3.bf16.msra.mxu1 %v2041_v2 }
 0x15e   : > { %v738_v44 = vadd.f32 %v2535_v55, %v707_v41  ;;  %v747_v45 = vmax.f32 %v737_v40, 0.0  ;;  %1844 = vmatprep.subr.bf16.mxu1 %v2216_v0 }
 0x160   : > { %v748_v46 = vmax.f32 %v738_v44, 0.0 }
 0x161   : > { %v711_v49 = vpop.f32.mrb[12].mxu0  ;;  %1845 = vmatpush3.bf16.msra.mxu1 %v2042_v3 }
 0x162   : > { %v712_v50 = vadd.f32 %v711_v49, %v602_v48  ;;  %v1760_v51 = vpop.f32.mrb[13].mxu0  ;;  %v755_v53 = vpack.c.bf16 %v748_v46, %v747_v45  ;;  %1846 = vmatprep.subr.bf16.mxu1 %v2216_v0 }
 0x163   : > { %v714_v54 = vpop.f32.mrb[14].mxu0 }
 0x164   : > { %v739_v56 = vadd.f32 %v2535_v55, %v712_v50  ;;  %v715_v57 = vadd.f32 %v714_v54, %v603_v52  ;;  %v1761_v58 = vpop.f32.mrb[15].mxu0  ;;  %1791 = vmatmul.mubr.bf16.gmra.mrb[12].mxu1 %v755_v53  ;;  %v2046_v54 = vld [vmem:[%s2718_s9 + $0x38] sm:$0xff]  }
 0x165   : > { %1794 = vmatprep.mubr.msk.bf16.mxu1 %vm2217_vm0, %v2216_v0  ;;  %1847 = vmatpush3.bf16.msra.mxu1 %v2043_v4  ;;  %v2049_v58 = vld [vmem:[#allocation7 + $0x10] sm:$0xff]  }
 0x166   : > { %v740_v59 = vadd.f32 %v2535_v55, %v715_v57  ;;  %v749_v60 = vmax.f32 %v739_v56, 0.0  ;;  %v2038_v55 = vld [vmem:[%s2716_s7 + $0x38] sm:$0xff]   ;;  %1848 = vmatprep.subr.bf16.mxu1 %v2216_v0  ;;  %v2048_v57 = vld [vmem:[#allocation7 + $0x8] sm:$0xff]  }
 0x167   : > { %1817 = vmatpush3.bf16.msra.mxu0 %v2038_v55  ;;  %v2047_v56 = vld [vmem:[#allocation7] sm:$0xff]  }
 0x168   : > { %v750_v61 = vmax.f32 %v740_v59, 0.0  ;;  %1874 = vmatprep.subr.bf16.mxu0 %v2216_v0  ;;  %v2050_v59 = vld [vmem:[#allocation7 + $0x18] sm:$0xff]  }
 0x169   : > { %1849 = vmatpush3.bf16.msra.mxu1 %v2044_v5 }
 0x16a   : > { %v756_v62 = vpack.c.bf16 %v750_v61, %v749_v60  ;;  %1850 = vmatprep.subr.bf16.mxu1 %v2216_v0  ;;  %v2051_v60 = vld [vmem:[#allocation7 + $0x20] sm:$0xff]   ;;  %v2052_v61 = vld [vmem:[#allocation7 + $0x28] sm:$0xff]  }
 0x16c   : > { %1795 = vmatmul.mubr.bf16.gmra.mrb[16].mxu1 %v756_v62  ;;  %v2053_v62 = vld [vmem:[#allocation7 + $0x30] sm:$0xff]  }
 0x16d   : > { %1798 = vmatprep.mubr.msk.bf16.mxu1 %vm2217_vm0, %v2216_v0  ;;  %1851 = vmatpush3.bf16.msra.mxu1 %v2045_v6 }
 0x16e   : > { %1852 = vmatprep.subr.bf16.mxu1 %v2216_v0 }
 0x171   : > { %1853 = vmatpush3.bf16.msra.mxu1 %v2046_v54 }
 0x174   : > { %1799 = vmatmul.mubr.bf16.gmra.mrb[20].mxu1 %v757_v22 }
 0x175   : > { %1854 = vmatprep.mubr.msk.bf16.mxu1 %vm2217_vm0, %v2216_v0 }
 0x227   : > { %v863_v8 = vpop.f32.mrb[4].mxu1 }
 0x228   : > { %v864_v9 = vadd.f32 %v1573_v7, %v863_v8  ;;  %v1784_v10 = vpop.f32.mrb[5].mxu1 }
 0x229   : > { %v866_v11 = vpop.f32.mrb[6].mxu1 }
 0x22a   : > { %v867_v12 = vadd.f32 %v1573_v7, %v866_v11  ;;  %v1785_v13 = vpop.f32.mrb[7].mxu1  ;;  %v902_v14 = vmax.f32 %v864_v9, 0.0 }
 0x22c   : > { %v903_v15 = vmax.f32 %v867_v12, 0.0 }
 0x22e   : > { %v912_v16 = vpack.c.bf16 %v903_v15, %v902_v14 }
 0x22f   : > { %v871_v17 = vpop.f32.mrb[8].mxu1 }
 0x230   : > { %v872_v18 = vadd.f32 %v1573_v7, %v871_v17  ;;  %v1788_v19 = vpop.f32.mrb[9].mxu1  ;;  %1819 = vmatmul.mubr.bf16.vlgmr.msra.gmra.mrb[16].mxu0 %v912_v16 }
 0x231   : > { %v874_v20 = vpop.f32.mrb[10].mxu1  ;;  %1822 = vmatprep.mubr.msk.bf16.mxu0 %vm2217_vm0, %v2216_v0  ;;  %1875 = vmatpush3.bf16.msra.mxu0 %v2047_v56 }
 0x232   : > { %v875_v21 = vadd.f32 %v1573_v7, %v874_v20  ;;  %v1789_v22 = vpop.f32.mrb[11].mxu1  ;;  %v904_v23 = vmax.f32 %v872_v18, 0.0  ;;  %1876 = vmatprep.subr.bf16.mxu0 %v2216_v0 }
 0x234   : > { %v905_v24 = vmax.f32 %v875_v21, 0.0 }
 0x235   : > { %1877 = vmatpush3.bf16.msra.mxu0 %v2048_v57 }
 0x236   : > { %v913_v25 = vpack.c.bf16 %v905_v24, %v904_v23  ;;  %1878 = vmatprep.subr.bf16.mxu0 %v2216_v0 }
 0x237   : > { %v879_v26 = vpop.f32.mrb[12].mxu1 }
 0x238   : > { %v880_v27 = vadd.f32 %v1573_v7, %v879_v26  ;;  %v1792_v28 = vpop.f32.mrb[13].mxu1  ;;  %1823 = vmatmul.mubr.bf16.gmra.mrb[20].mxu0 %v913_v25 }
 0x239   : > { %v882_v29 = vpop.f32.mrb[14].mxu1  ;;  %1826 = vmatprep.mubr.msk.bf16.mxu0 %vm2217_vm0, %v2216_v0  ;;  %1879 = vmatpush3.bf16.msra.mxu0 %v2049_v58 }
 0x23a   : > { %v883_v30 = vadd.f32 %v1573_v7, %v882_v29  ;;  %v1793_v31 = vpop.f32.mrb[15].mxu1  ;;  %v906_v32 = vmax.f32 %v880_v27, 0.0  ;;  %1880 = vmatprep.subr.bf16.mxu0 %v2216_v0 }
 0x23c   : > { %v907_v33 = vmax.f32 %v883_v30, 0.0 }
 0x23d   : > { %1881 = vmatpush3.bf16.msra.mxu0 %v2050_v59 }
 0x23e   : > { %v914_v34 = vpack.c.bf16 %v907_v33, %v906_v32  ;;  %1882 = vmatprep.subr.bf16.mxu0 %v2216_v0 }
 0x23f   : > { %v887_v35 = vpop.f32.mrb[16].mxu1 }
 0x240   : > { %v888_v36 = vadd.f32 %v1573_v7, %v887_v35  ;;  %v1796_v37 = vpop.f32.mrb[17].mxu1  ;;  %1827 = vmatmul.mubr.bf16.gmra.mrb[24].mxu0 %v914_v34 }
 0x241   : > { %v890_v38 = vpop.f32.mrb[18].mxu1  ;;  %1830 = vmatprep.mubr.msk.bf16.mxu0 %vm2217_vm0, %v2216_v0  ;;  %1883 = vmatpush3.bf16.msra.mxu0 %v2051_v60 }
 0x242   : > { %v891_v39 = vadd.f32 %v1573_v7, %v890_v38  ;;  %v1797_v40 = vpop.f32.mrb[19].mxu1  ;;  %v908_v41 = vmax.f32 %v888_v36, 0.0  ;;  %1884 = vmatprep.subr.bf16.mxu0 %v2216_v0 }
 0x244   : > { %v909_v42 = vmax.f32 %v891_v39, 0.0 }
 0x245   : > { %1885 = vmatpush3.bf16.msra.mxu0 %v2052_v61 }
 0x246   : > { %v915_v43 = vpack.c.bf16 %v909_v42, %v908_v41  ;;  %1886 = vmatprep.subr.bf16.mxu0 %v2216_v0 }
 0x247   : > { %v895_v44 = vpop.f32.mrb[20].mxu1 }
 0x248   : > { %v896_v45 = vadd.f32 %v1573_v7, %v895_v44  ;;  %v1800_v46 = vpop.f32.mrb[21].mxu1  ;;  %1831 = vmatmul.mubr.bf16.gmra.mrb[28].mxu0 %v915_v43  ;;  %v2054_v44 = vld [vmem:[#allocation7 + $0x38] sm:$0xff]  }
 0x249   : > { %v898_v48 = vpop.f32.mrb[22].mxu1  ;;  %1834 = vmatprep.mubr.msk.bf16.mxu0 %vm2217_vm0, %v2216_v0  ;;  %1887 = vmatpush3.bf16.msra.mxu0 %v2053_v62 }
 0x24a   : > { %v899_v49 = vadd.f32 %v1573_v7, %v898_v48  ;;  %v1801_v50 = vpop.f32.mrb[23].mxu1  ;;  %v910_v51 = vmax.f32 %v896_v45, 0.0  ;;  %1888 = vmatprep.subr.bf16.mxu0 %v2216_v0  ;;  %v1591_v45 = vld [vmem:[%s2719_s10] ss:$0 sm:$0xff] }
 0x24c   : > { %v911_v52 = vmax.f32 %v899_v49, 0.0 }
 0x24d   : > { %1889 = vmatpush3.bf16.msra.mxu0 %v2054_v44 }
 0x24e   : > { %v916_v53 = vpack.c.bf16 %v911_v52, %v910_v51 }
 0x250   : > { %1835 = vmatmul.mubr.bf16.gmra.mrb[32].mxu0 %v916_v53 }
 0x251   : > { %1890 = vmatprep.mubr.msk.bf16.mxu0 %vm2217_vm0, %v2216_v0 }
 0x303   : > { %v1022_v55 = vpop.f32.mrb[16].mxu0 }
 0x304   : > { %v1023_v63 = vadd.f32 %v1582_v47, %v1022_v55  ;;  %v1820_v1 = vpop.f32.mrb[17].mxu0 }
 0x305   : > { %v1025_v2 = vpop.f32.mrb[18].mxu0 }
 0x306   : > { %v1026_v3 = vadd.f32 %v1582_v47, %v1025_v2  ;;  %v1821_v4 = vpop.f32.mrb[19].mxu0  ;;  %v1061_v5 = vmax.f32 %v1023_v63, 0.0 }
 0x308   : > { %v1062_v6 = vmax.f32 %v1026_v3, 0.0 }
 0x30a   : > { %v1071_v7 = vpack.c.bf16 %v1062_v6, %v1061_v5 }
 0x30b   : > { %v1030_v8 = vpop.f32.mrb[20].mxu0 }
 0x30c   : > { %v1031_v9 = vadd.f32 %v1582_v47, %v1030_v8  ;;  %v1824_v10 = vpop.f32.mrb[21].mxu0  ;;  %1855 = vmatmul.mubr.bf16.vlgmr.msra.gmra.mrb[24].mxu1 %v1071_v7 }
 0x30d   : > { %v1033_v11 = vpop.f32.mrb[22].mxu0  ;;  %1858 = vmatprep.mubr.msk.bf16.mxu1 %vm2217_vm0, %v2216_v0 }
 0x30e   : > { %v1034_v12 = vadd.f32 %v1582_v47, %v1033_v11  ;;  %v1825_v13 = vpop.f32.mrb[23].mxu0  ;;  %v1063_v14 = vmax.f32 %v1031_v9, 0.0 }
 0x310   : > { %v1064_v15 = vmax.f32 %v1034_v12, 0.0 }
 0x312   : > { %v1072_v16 = vpack.c.bf16 %v1064_v15, %v1063_v14 }
 0x313   : > { %v1038_v17 = vpop.f32.mrb[24].mxu0 }
 0x314   : > { %v1039_v18 = vadd.f32 %v1582_v47, %v1038_v17  ;;  %v1828_v19 = vpop.f32.mrb[25].mxu0  ;;  %1859 = vmatmul.mubr.bf16.gmra.mrb[28].mxu1 %v1072_v16 }
 0x315   : > { %v1041_v20 = vpop.f32.mrb[26].mxu0  ;;  %1862 = vmatprep.mubr.msk.bf16.mxu1 %vm2217_vm0, %v2216_v0 }
 0x316   : > { %v1042_v21 = vadd.f32 %v1582_v47, %v1041_v20  ;;  %v1829_v22 = vpop.f32.mrb[27].mxu0  ;;  %v1065_v23 = vmax.f32 %v1039_v18, 0.0 }
 0x318   : > { %v1066_v24 = vmax.f32 %v1042_v21, 0.0 }
 0x31a   : > { %v1073_v25 = vpack.c.bf16 %v1066_v24, %v1065_v23 }
 0x31b   : > { %v1046_v26 = vpop.f32.mrb[28].mxu0 }
 0x31c   : > { %v1047_v27 = vadd.f32 %v1582_v47, %v1046_v26  ;;  %v1832_v28 = vpop.f32.mrb[29].mxu0  ;;  %1863 = vmatmul.mubr.bf16.gmra.mrb[32].mxu1 %v1073_v25 }
 0x31d   : > { %v1049_v29 = vpop.f32.mrb[30].mxu0  ;;  %1866 = vmatprep.mubr.msk.bf16.mxu1 %vm2217_vm0, %v2216_v0  ;;  %v1600_v28 = vld [vmem:[%s2721_s12] ss:$0 sm:$0xff] }
 0x31e   : > { %v1050_v30 = vadd.f32 %v1582_v47, %v1049_v29  ;;  %v1833_v31 = vpop.f32.mrb[31].mxu0  ;;  %v1067_v32 = vmax.f32 %v1047_v27, 0.0 }
 0x320   : > { %v1068_v33 = vmax.f32 %v1050_v30, 0.0 }
 0x322   : > { %v1074_v34 = vpack.c.bf16 %v1068_v33, %v1067_v32 }
 0x323   : > { %v1054_v35 = vpop.f32.mrb[32].mxu0 }
 0x324   : > { %v1055_v36 = vadd.f32 %v1582_v47, %v1054_v35  ;;  %v1836_v37 = vpop.f32.mrb[33].mxu0  ;;  %1867 = vmatmul.mubr.bf16.gmra.mrb[36].mxu1 %v1074_v34 }
 0x325   : > { %v1057_v38 = vpop.f32.mrb[34].mxu0  ;;  %1870 = vmatprep.mubr.msk.bf16.mxu1 %vm2217_vm0, %v2216_v0 }
 0x326   : > { %v1058_v39 = vadd.f32 %v1582_v47, %v1057_v38  ;;  %v1837_v40 = vpop.f32.mrb[35].mxu0  ;;  %v1069_v41 = vmax.f32 %v1055_v36, 0.0 }
 0x328   : > { %v1070_v42 = vmax.f32 %v1058_v39, 0.0 }
 0x32a   : > { %v1075_v43 = vpack.c.bf16 %v1070_v42, %v1069_v41 }
 0x32c   : > { %1871 = vmatmul.mubr.bf16.gmra.mrb[40].mxu1 %v1075_v43 }
 0x3df   : > { %v1181_v46 = vpop.f32.mrb[24].mxu1 }
 0x3e0   : > { %v1182_v48 = vadd.f32 %v1591_v45, %v1181_v46  ;;  %v1856_v49 = vpop.f32.mrb[25].mxu1 }
 0x3e1   : > { %v1184_v50 = vpop.f32.mrb[26].mxu1 }
 0x3e2   : > { %v1185_v51 = vadd.f32 %v1591_v45, %v1184_v50  ;;  %v1857_v52 = vpop.f32.mrb[27].mxu1  ;;  %v1220_v53 = vmax.f32 %v1182_v48, 0.0 }
 0x3e4   : > { %v1221_v54 = vmax.f32 %v1185_v51, 0.0 }
 0x3e6   : > { %v1230_v56 = vpack.c.bf16 %v1221_v54, %v1220_v53 }
 0x3e7   : > { %v1189_v57 = vpop.f32.mrb[28].mxu1 }
 0x3e8   : > { %v1190_v58 = vadd.f32 %v1591_v45, %v1189_v57  ;;  %v1860_v59 = vpop.f32.mrb[29].mxu1  ;;  %1891 = vmatmul.mubr.bf16.vlgmr.msra.gmra.mrb[36].mxu0 %v1230_v56 }
 0x3e9   : > { %v1192_v60 = vpop.f32.mrb[30].mxu1  ;;  %1894 = vmatprep.mubr.msk.bf16.mxu0 %vm2217_vm0, %v2216_v0 }
 0x3ea   : > { %v1193_v61 = vadd.f32 %v1591_v45, %v1192_v60  ;;  %v1861_v62 = vpop.f32.mrb[31].mxu1  ;;  %v1222_v47 = vmax.f32 %v1190_v58, 0.0 }
 0x3ec   : > { %v1223_v55 = vmax.f32 %v1193_v61, 0.0 }
 0x3ee   : > { %v1231_v63 = vpack.c.bf16 %v1223_v55, %v1222_v47 }
 0x3ef   : > { %v1197_v1 = vpop.f32.mrb[32].mxu1 }
 0x3f0   : > { %v1198_v2 = vadd.f32 %v1591_v45, %v1197_v1  ;;  %v1864_v3 = vpop.f32.mrb[33].mxu1  ;;  %1895 = vmatmul.mubr.bf16.gmra.mrb[40].mxu0 %v1231_v63 }
 0x3f1   : > { %v1200_v4 = vpop.f32.mrb[34].mxu1  ;;  %1898 = vmatprep.mubr.msk.bf16.mxu0 %vm2217_vm0, %v2216_v0 }
 0x3f2   : > { %v1201_v5 = vadd.f32 %v1591_v45, %v1200_v4  ;;  %v1865_v6 = vpop.f32.mrb[35].mxu1  ;;  %v1224_v7 = vmax.f32 %v1198_v2, 0.0 }
 0x3f4   : > { %v1225_v8 = vmax.f32 %v1201_v5, 0.0 }
 0x3f6   : > { %v1232_v9 = vpack.c.bf16 %v1225_v8, %v1224_v7 }
 0x3f7   : > { %v1205_v10 = vpop.f32.mrb[36].mxu1 }
 0x3f8   : > { %v1206_v11 = vadd.f32 %v1591_v45, %v1205_v10  ;;  %v1868_v12 = vpop.f32.mrb[37].mxu1  ;;  %1899 = vmatmul.mubr.bf16.gmra.mrb[44].mxu0 %v1232_v9 }
 0x3f9   : > { %v1208_v13 = vpop.f32.mrb[38].mxu1  ;;  %1902 = vmatprep.mubr.msk.bf16.mxu0 %vm2217_vm0, %v2216_v0 }
 0x3fa   : > { %v1209_v14 = vadd.f32 %v1591_v45, %v1208_v13  ;;  %v1869_v15 = vpop.f32.mrb[39].mxu1  ;;  %v1226_v16 = vmax.f32 %v1206_v11, 0.0 }
 0x3fc   : > { %v1227_v17 = vmax.f32 %v1209_v14, 0.0 }
 0x3fe   : > { %v1233_v18 = vpack.c.bf16 %v1227_v17, %v1226_v16 }
 0x3ff   : > { %v1213_v19 = vpop.f32.mrb[40].mxu1 }
 0x400   : > { %v1214_v20 = vadd.f32 %v1591_v45, %v1213_v19  ;;  %v1872_v21 = vpop.f32.mrb[41].mxu1  ;;  %1903 = vmatmul.mubr.bf16.gmra.mrb[48].mxu0 %v1233_v18 }
 0x401   : > { %v1216_v22 = vpop.f32.mrb[42].mxu1  ;;  %1906 = vmatprep.mubr.msk.bf16.mxu0 %vm2217_vm0, %v2216_v0 }
 0x402   : > { %v1217_v23 = vadd.f32 %v1591_v45, %v1216_v22  ;;  %v1873_v24 = vpop.f32.mrb[43].mxu1  ;;  %v1228_v25 = vmax.f32 %v1214_v20, 0.0 }
 0x404   : > { %v1229_v26 = vmax.f32 %v1217_v23, 0.0 }
 0x406   : > { %v1234_v27 = vpack.c.bf16 %v1229_v26, %v1228_v25 }
 0x408   : > { %1907 = vmatmul.mubr.bf16.gmra.mrb[52].mxu0 %v1234_v27 }
 0x4bb   : > { %v1340_v29 = vpop.f32.mrb[36].mxu0 }
 0x4bc   : > { %v1892_v30 = vpop.f32.mrb[37].mxu0  ;;  %v1341_v32 = vadd.f32 %v1600_v28, %v1340_v29 }
 0x4bd   : > { %v1343_v31 = vpop.f32.mrb[38].mxu0 }
 0x4be   : > { %v1344_v33 = vadd.f32 %v1600_v28, %v1343_v31  ;;  %v1893_v34 = vpop.f32.mrb[39].mxu0 }
 0x4c0   : > { %v1656_v0 = vpack.c.bf16 %v1344_v33, %v1341_v32 }
 0x4c2   : > { %1657 = vst [vmem:[%s2650_s13] sm:$0xff] %v1656_v0  }
 0x4c3   : > { %v1348_v35 = vpop.f32.mrb[40].mxu0 }
 0x4c4   : > { %v1896_v36 = vpop.f32.mrb[41].mxu0  ;;  %v1349_v38 = vadd.f32 %v1600_v28, %v1348_v35 }
 0x4c5   : > { %v1351_v37 = vpop.f32.mrb[42].mxu0 }
 0x4c6   : > { %v1352_v39 = vadd.f32 %v1600_v28, %v1351_v37  ;;  %v1897_v40 = vpop.f32.mrb[43].mxu0 }
 0x4c8   : > { %v1661_v41 = vpack.c.bf16 %v1352_v39, %v1349_v38 }
 0x4ca   : > { %1682 = vst [vmem:[%s2650_s13 + $0x8] sm:$0xff] %v1661_v41  }
 0x4cb   : > { %v1356_v42 = vpop.f32.mrb[44].mxu0 }
 0x4cc   : > { %v1900_v43 = vpop.f32.mrb[45].mxu0  ;;  %v1357_v45 = vadd.f32 %v1600_v28, %v1356_v42 }
 0x4cd   : > { %v1359_v44 = vpop.f32.mrb[46].mxu0 }
 0x4ce   : > { %v1360_v46 = vadd.f32 %v1600_v28, %v1359_v44  ;;  %v1901_v48 = vpop.f32.mrb[47].mxu0 }
 0x4d0   : > { %v1666_v49 = vpack.c.bf16 %v1360_v46, %v1357_v45 }
 0x4d2   : > { %1683 = vst [vmem:[%s2650_s13 + $0x10] sm:$0xff] %v1666_v49  }
 0x4d3   : > { %v1364_v50 = vpop.f32.mrb[48].mxu0 }
 0x4d4   : > { %v1904_v51 = vpop.f32.mrb[49].mxu0  ;;  %v1365_v53 = vadd.f32 %v1600_v28, %v1364_v50 }
 0x4d5   : > { %v1367_v52 = vpop.f32.mrb[50].mxu0 }
 0x4d6   : > { %v1368_v54 = vadd.f32 %v1600_v28, %v1367_v52  ;;  %v1905_v56 = vpop.f32.mrb[51].mxu0 }
 0x4d8   : > { %v1671_v57 = vpack.c.bf16 %v1368_v54, %v1365_v53 }
 0x4da   : > { %1684 = vst [vmem:[%s2650_s13 + $0x18] sm:$0xff] %v1671_v57  }
 0x4db   : > { %v1372_v58 = vpop.f32.mrb[52].mxu0 }
 0x4dc   : > { %v1908_v59 = vpop.f32.mrb[53].mxu0  ;;  %v1373_v61 = vadd.f32 %v1600_v28, %v1372_v58 }
 0x4dd   : > { %v1375_v60 = vpop.f32.mrb[54].mxu0 }
 0x4de   : > { %v1376_v62 = vadd.f32 %v1600_v28, %v1375_v60  ;;  %v1909_v47 = vpop.f32.mrb[55].mxu0 }
 0x4e0   : > { %v1676_v55 = vpack.c.bf16 %v1376_v62, %v1373_v61 }
 0x4e2   : > { %1685 = vst [vmem:[%s2650_s13 + $0x20] sm:$0xff] %v1676_v55  }
 0x4e3   : > { %2152 = shalt.err (!%p2149_p11)
}
 0x4e4   : > { %s2153_s19 = scalar_lea.hbm %s2663_s27, 640  ;;  %s2157_s30 = scalar_lea.hbm %s2752_s15, 1280 }
 0x4e5   : > { %p2154_p13 = scmp.ne.s32.totalorder %s2663_s27, %s2153_s19  ;;  %p2158_p6 = scmp.lt.u32.totalorder %s2663_s27, %s2752_s15 }
 0x4e6   : > { %p2159_p5 = scmp.lt.u32.totalorder %s2157_s30, %s2153_s19  ;;  %p2161_p9 = scmp.lt.u32.totalorder %s2153_s19, %s2663_s27 }
 0x4e7   : > { %p2155_p1 = pnand %p2154_p13, %p2753_p10 }
 0x4e8   : > { %p2160_p12 = por %p2159_p5, %p2158_p6 }
 0x4e9   : > { %p2156_p0 = pneg %p2155_p1 }
 0x4ea   : > { %p2162_p2 = por %p2161_p9, %p2160_p12 }
 0x4ec   : > { %p2163_p3 = pnand %p2162_p2, %p2156_p0 }
 0x4ee   : > { %2166 = shalt.err (!%p2163_p3)
}
 0x4ef   : > { %s2220_s28 = smov 64   ;;  %s2221_s25 = smov 4  }
 0x4f0   : > { %1925 = dma.vmem_to_hbm [thread:$0]  (%p2753_p10), %s2658_s23, 640, %s2663_s27, %s2668_s29, %s2220_s28, %s2220_s28, %s2221_s25  }
 0x4f1 PF: > { %s2754_s21 = sld [smem:[#allocation14_spill]]  ;;  %s2755_s14 = sld [smem:[#allocation12_spill]] }
 0x4f2   : > { %s2756_s22 = sld [smem:[#allocation17_spill]] }
 0x4f7   : > { %p1947_p4 = scmp.ge.s32.totalorder %s2754_s21, 2  ;;  %s1458_s17 = sand.u32 1, %s2755_s14  }
 0x4f8   : > { %p2757_p7 = scmp.ne.s32.totalorder %s2756_s22, 0  ;;  %s1459_s24 = scalar_lea.sflag [#allocation4], %s1458_s17 }
 0x4fa   : > { %p1938_p8 = pnand %p1947_p4, %p2757_p7 }
 0x4fc   : > { %2192 = dma.done.wait (!%p1938_p8), %s1459_s24, 640  }
 0x4fd   : > { %2194 = vsyncadd (!%p1938_p8), %s1459_s24, 4294966656  ;;  %s2758_s28 = sld [smem:[#allocation15_spill]]  ;;  %s2759_s19 = sld [smem:[#allocation13_spill]] }
 0x4fe   : > { %s2760_s27 = sld [smem:[#allocation16_spill]]  ;;  %s2761_s25 = smov %s2201_s26 }
 0x503   : > { %p25_p11 = scmp.ge.s32.totalorder %s2758_s28, 4   ;;  %s2762_s26 = smov %s2759_s19 }
 0x505   :  { %27 = sbr.rel (!%p25_p11) target bundleno = 8 (0x8), region = 123 }
 0x50c   :  { %1464 = vsyncpa [#allocation3], 1 }
 0x50d   :  { %1466 = vsyncpa [#allocation3 + $0x1], 1 }
 0x50e   :  { %1467 = vsyncpa [#allocation6], 1 }
 0x50f   :  { %1468 = vsyncpa [#allocation4], 1 }
 0x510   :  { %1470 = vsyncpa [#allocation4 + $0x1], 1 }

// kernel: tpu_custom_call.1
= control target key start
LH: loop header
LB: loop body
LE: loop exit
PB: predicated region body
PF: predicated region fallthrough
CT: control target
= control target key end

     0   :  { %s2709_s0 = inlined_call_operand.vmem [shape: bf16[160,16], index: 0, kind: input, shape index: {}]   ;;  %s2710_s1 = inlined_call_operand.vmem [shape: bf16[160,1], index: 1, kind: input, shape index: {}]   ;;  %s2711_s2 = inlined_call_operand.hbm [shape: bf16[16,128], index: 2, kind: input, shape index: {}]   ;;  %s2712_s3 = inlined_call_operand.vmem [shape: f32[1,128], index: 3, kind: input, shape index: {}]   ;;  %s2713_s4 = inlined_call_operand.hbm [shape: f32[1,128], index: 4, kind: input, shape index: {}]   ;;  %s2714_s5 = inlined_call_operand.vmem [shape: bf16[128,128], index: 5, kind: input, shape index: {}]   ;;  %s2715_s6 = inlined_call_operand.vmem [shape: f32[1,128], index: 6, kind: input, shape index: {}]   ;;  %s2716_s7 = inlined_call_operand.vmem [shape: bf16[128,128], index: 7, kind: input, shape index: {}]   ;;  %s2717_s8 = inlined_call_operand.vmem [shape: f32[1,128], index: 8, kind: input, shape index: {}]   ;;  %s2718_s9 = inlined_call_operand.vmem [shape: bf16[128,128], index: 9, kind: input, shape index: {}]   ;;  %s2719_s10 = inlined_call_operand.vmem [shape: f32[1,128], index: 10, kind: input, shape index: {}]   ;;  %s2720_s11 = inlined_call_operand.hbm [shape: bf16[128,128], index: 11, kind: input, shape index: {}]   ;;  %s2721_s12 = inlined_call_operand.vmem [shape: f32[1,128], index: 12, kind: input, shape index: {}]   ;;  %s2722_s13 = inlined_call_operand.hbm [shape: bf16[160,128], index: 13, kind: output, shape index: {}]  }
   0x1   :  { %2733 = sst [smem:[#allocation18_spill]] %s2713_s4 }
   0x2   :  { %2734 = sst [smem:[#allocation19_spill]] %s2722_s13 }
   0x3   :  { %18 = vsyncpa [#allocation3], 0 }
   0x4   :  { %19 = vsyncpa [#allocation6], 0 }
   0x5   :  { %20 = vsyncpa [#allocation4], 0 }
   0x6   :  { %22 = vsyncpa [#allocation4 + $0x1], 0  ;;  %s2292_s25 = smov 0   ;;  %s2294_s26 = smov 0  }
   0x7   :  { %s2296_s27 = smov 0   ;;  %s2298_s28 = smov 0  }
   0x8 LB: > { %2735 = sst [smem:[#allocation12_spill]] %s2197_s25  ;;  %s2313_s29 = sadd.s32 4294967295, %s2209_s28   ;;  %s2209_s28 = sphi %s2298_s28, %s2758_s28   ;;  %s2205_s27 = sphi %s2296_s27, %s2760_s27   ;;  %s2201_s26 = sphi %s2294_s26, %s2762_s26   ;;  %s2197_s25 = sphi %s2292_s25, %s2761_s25  }
   0x9   : > { %2736 = sst [smem:[#allocation13_spill]] %s2205_s27  ;;  %s1548_s30 = sadd.s32 4294967294, %s2209_s28  }
   0xa   : > { %2737 = sst [smem:[#allocation14_spill]] %s2209_s28  ;;  %s2317_s14 = sadd.s32 1, %s2209_s28  }
   0xb   : > { %2738 = sst [smem:[#allocation15_spill]] %s2317_s14  ;;  %s318_s15 = sadd.s32 1, %s2205_s27 }
   0xc   : > { %s315_s16 = ssub.s32 %s2209_s28, %s2317_s14  ;;  %p328_p0 = scmp.ne.s32.totalorder %s2205_s27, %s2201_s26 }
   0xd   : > { %p316_p1 = scmp.eq.s32.totalorder %s315_s16, 0  ;;  %p329_p2 = scmp.eq.s32.totalorder %s2313_s29, 1 }
   0xe   : > { %p334_p3 = scmp.ne.s32.totalorder %s2201_s26, %s2197_s25  ;;  %p335_p4 = scmp.eq.s32.totalorder %s1548_s30, 1 }
   0xf   : > { %s2328_s17 = scalar_select %p316_p1, %s2205_s27, %s318_s15  }
  0x10   : > { %p2330_p5 = por %p329_p2, %p328_p0  ;;  %p2334_p6 = por %p335_p4, %p334_p3 }
  0x11   : > { %2739 = sst [smem:[#allocation16_spill]] %s2328_s17  ;;  %p1549_p7 = scmp.ge.s32.totalorder %s2209_s28, 1 }
  0x12   : > { %s2740_s18 = scalar_select %p2330_p5, 1, 0 }
  0x13   : > { %s2741_s19 = scalar_select %p2334_p6, 1, 0 }
  0x14   : > { %p342_p8 = scmp.lt.s32.totalorder %s2209_s28, 3  ;;  %p2728_p9 = scmp.eq.s32.totalorder %s2313_s29, 0 }
  0x15   : > { %2742 = sst [smem:[#allocation17_spill]] %s2741_s19  ;;  %s2211_s21 = smov [#allocation5]  }
  0x16   : > { %p2341_p10 = pnand %p1549_p7, %p342_p8  ;;  %s371_s22 = sshll.u32 %s2211_s21, 4  ;;  %s372_s22 = int_to_ptr.vmem [resolvable:$true] %s371_s22 }
  0x17   : > { %s2212_s23 = smov [#allocation2]   ;;  %s2213_s15 = smov [#allocation7]  }
  0x18   : > { %s2743_s20 = scalar_select %p2341_p10, 1, 0 }
  0x19   : > { %p1927_p11 = pneg %p2341_p10  ;;  %s354_s24 = sshll.u32 %s2212_s23, 4  ;;  %s2353_s24 = int_to_ptr.vmem [resolvable:$true] %s354_s24 }
  0x1a   : > { %s2355_s16 = sshll.u32 %s2213_s15, 4  ;;  %s2745_s4 = sld [smem:[#allocation18_spill]]  ;;  %s400_s16 = int_to_ptr.vmem [resolvable:$true] %s2355_s16 }
  0x1b   : > { %p2349_p12 = pnand %p2728_p9, %p1927_p11 }
  0x1d   : > { %p2365_p0 = pneg %p2349_p12 }
  0x20   : > { %s2055_s21 = scalar_lea.hbm %s2745_s4, 16 }
  0x21   : > { %p2056_p13 = scmp.ne.s32.totalorder %s2745_s4, %s2055_s21  ;;  %p2062_p3 = scmp.lt.u32.totalorder %s2055_s21, %s2745_s4 }
  0x23   : > { %p2058_p1 = pnand %p2365_p0, %p2056_p13 }
  0x25   : > { %p2059_p2 = pneg %p2058_p1 }
  0x27   : > { %p2064_p4 = pnand %p2062_p3, %p2059_p2 }
  0x29   : > { %2067 = shalt.err (!%p2064_p4)
}
  0x2a   : > { %s2068_s27 = scalar_lea.vmem %s372_s22, 16  ;;  %s2075_s14 = scalar_lea.vmem %s372_s22, 32 }
  0x2b   : > { %p2069_p7 = scmp.ne.s32.totalorder %s372_s22, %s2068_s27  ;;  %p2076_p9 = scmp.lt.s32.totalorder %s372_s22, %s372_s22 }
  0x2c   : > { %p2077_p6 = scmp.lt.s32.totalorder %s2075_s14, %s2068_s27 }
  0x2d   : > { %p2071_p8 = pnand %p2069_p7, %p2365_p0 }
  0x2e   : > { %p2078_p5 = por %p2077_p6, %p2076_p9 }
  0x2f   : > { %p2072_p11 = pneg %p2071_p8 }
  0x31   : > { %p2079_p10 = pnand %p2078_p5, %p2072_p11 }
  0x33   : > { %2082 = shalt.err (!%p2079_p10)
}
  0x34   : > { %1933 = dma.hbm_to_vmem [thread:$0]  (!%p2349_p12), %s2745_s4, 16, %s372_s22, [#allocation6]  }
  0x35   : > { %s2083_s15 = scalar_lea.hbm %s2711_s2, 128 }
  0x36   : > { %p2084_p13 = scmp.ne.s32.totalorder %s2711_s2, %s2083_s15  ;;  %p2090_p5 = scmp.lt.u32.totalorder %s2083_s15, %s2711_s2 }
  0x38   : > { %p2086_p1 = pnand %p2084_p13, %p2365_p0 }
  0x3a   : > { %p2087_p6 = pneg %p2086_p1 }
  0x3c   : > { %p2092_p9 = pnand %p2090_p5, %p2087_p6 }
  0x3e   : > { %2095 = shalt.err (!%p2092_p9)
}
  0x3f   : > { %s2096_s22 = scalar_lea.vmem %s2353_s24, 128  ;;  %p2104_p4 = scmp.lt.s32.totalorder %s2353_s24, %s2353_s24 }
  0x40   : > { %p2097_p10 = scmp.ne.s32.totalorder %s2353_s24, %s2096_s22  ;;  %p2105_p7 = scmp.lt.s32.totalorder %s2096_s22, %s2096_s22 }
  0x42   : > { %p2099_p2 = pnand %p2097_p10, %p2365_p0  ;;  %p2106_p8 = por %p2105_p7, %p2104_p4 }
  0x44   : > { %p2100_p3 = pneg %p2099_p2 }
  0x46   : > { %p2107_p11 = pnand %p2106_p8, %p2100_p3 }
  0x48   : > { %2110 = shalt.err (!%p2107_p11)
}
  0x49   : > { %s2214_s13 = smov 64   ;;  %s2215_s28 = smov 4  }
  0x4a   : > { %1930 = dma.hbm_to_vmem [thread:$0]  (!%p2349_p12), %s2711_s2, 128, %s2353_s24, [#allocation3], %s2214_s13, %s2214_s13, %s2215_s28  }
  0x4b   : > { %s2111_s15 = scalar_lea.hbm %s2720_s11, 1024 }
  0x4c   : > { %p2112_p13 = scmp.ne.s32.totalorder %s2720_s11, %s2111_s15  ;;  %p2118_p5 = scmp.lt.u32.totalorder %s2111_s15, %s2720_s11 }
  0x4e   : > { %p2114_p1 = pnand %p2112_p13, %p2365_p0 }
  0x50   : > { %p2115_p6 = pneg %p2114_p1 }
  0x52   : > { %p2120_p9 = pnand %p2118_p5, %p2115_p6 }
  0x54   : > { %2123 = shalt.err (!%p2120_p9)
}
  0x55   : > { %s2124_s17 = scalar_lea.vmem %s400_s16, 1024  ;;  %p2132_p4 = scmp.lt.s32.totalorder %s400_s16, %s400_s16 }
  0x56   : > { %p2125_p10 = scmp.ne.s32.totalorder %s400_s16, %s2124_s17  ;;  %p2133_p7 = scmp.lt.s32.totalorder %s2124_s17, %s2124_s17 }
  0x58   : > { %p2127_p2 = pnand %p2125_p10, %p2365_p0  ;;  %p2134_p8 = por %p2133_p7, %p2132_p4 }
  0x5a   : > { %p2128_p3 = pneg %p2127_p2 }
  0x5c   : > { %p2135_p11 = pnand %p2134_p8, %p2128_p3 }
  0x5e   : > { %2138 = shalt.err (!%p2135_p11)
}
  0x5f   : > { %1936 = dma.hbm_to_vmem [thread:$0]  (!%p2349_p12), %s2720_s11, 1024, %s400_s16, [#allocation6], %s2214_s13, %s2214_s13, %s2215_s28  }
  0x60   : > { %p2747_p13 = scmp.ne.s32.totalorder %s2743_s20, 0 }
  0x61   : > { %p2748_p1 = scmp.eq.s32.totalorder (!%p2747_p13), %s2313_s29, 0 }
  0x62   : > { %436 = sbr.rel (%p2747_p13) target bundleno = 1265 (0x4f1), region = 72 }
  0x69   : > { %2184 = dma.done.wait (%p2748_p1), [#allocation3], 128   ;;  %p2749_p0 = pmov %p2748_p1 }
  0x6b   : > { %2186 = vsyncadd (%p2749_p0), [#allocation3], 4294967168  ;;  %p2750_p6 = pmov %p2749_p0 }
  0x6c   : > { %p2751_p5 = pmov %p2749_p0 }
  0x6d   : > { %2188 = dma.done.wait (%p2750_p6), [#allocation6], 1040  }
  0x6e   : > { %2190 = vsyncadd (%p2751_p5), [#allocation6], 4294966256  ;;  %s493_s4 = smul.u32 10, %s2313_s29  ;;  %v2216_v0 = vmov 0.0   ;;  %vm2217_vm0 = vmmov 0   ;;  %v2218_v1 = vmov 0  }
  0x6f   : > { %1744 = vmatprep.subr.bf16.mxu0 %v2216_v0  ;;  %1910 = vmatprep.subr.bf16.mxu1 %v2216_v0  ;;  %v2017_v2 = vld [vmem:[#allocation2] sm:$0xff]   ;;  %vm637_vm1 = vcmask 130048   ;;  %v2023_v16 = vld [vmem:[%s2714_s5] sm:$0xff]   ;;  %v2024_v22 = vld [vmem:[%s2714_s5 + $0x8] sm:$0xff]   ;;  %s1632_s28 = smul.u32 640, %s2313_s29  ;;  %s2752_s15 = sld [smem:[#allocation19_spill]] }
  0x70   : > { %1746 = vmatprep.mubr.msk.bf16.mxu0 %vm2217_vm0, %v2216_v0  ;;  %1762 = vmatprep.mubr.msk.bf16.mxu1 %vm2217_vm0, %v2216_v0  ;;  %p494_p12 = scmp.lt.s32.totalorder %s493_s4, 19  ;;  %v2025_v27 = vld [vmem:[%s2714_s5 + $0x10] sm:$0xff]   ;;  %v2026_v30 = vld [vmem:[%s2714_s5 + $0x18] sm:$0xff]   ;;  %v2027_v31 = vld [vmem:[%s2714_s5 + $0x20] sm:$0xff]   ;;  %p2753_p10 = scmp.ne.s32.totalorder %s2740_s18, 0 }
  0x71   : > { %1990 = vset.pattern.permute.xlu0 %v2218_v1  ;;  %2001 = vset.pattern.permute.xlu1 %v2218_v1  ;;  %v2028_v33 = vld [vmem:[%s2714_s5 + $0x28] sm:$0xff]   ;;  %v2029_v34 = vld [vmem:[%s2714_s5 + $0x30] sm:$0xff]   ;;  %v2030_v35 = vld [vmem:[%s2714_s5 + $0x38] sm:$0xff]   ;;  %s2219_s22 = smov [#allocation8]  }
  0x72   : > { %s2764_s4 = smov (!%p494_p12, %s493_s4), 19  ;;  %1745 = vmatpush3.bf16.msra.mxu0 %v2017_v2  ;;  %1911 = vmatpush3.bf16.msra.mxu1 %v2017_v2  ;;  %v2031_v36 = vld [vmem:[%s2716_s7] sm:$0xff]   ;;  %v2032_v37 = vld [vmem:[%s2716_s7 + $0x8] sm:$0xff]   ;;  %v2033_v38 = vld [vmem:[%s2716_s7 + $0x10] sm:$0xff]   ;;  %s2143_s17 = sshll.u32 %s2219_s22, 4  ;;  %s2144_s17 = int_to_ptr.vmem [resolvable:$false] %s2143_s17 }
  0x73   : > { %s1558_s20 = sshll.u32 %s2764_s4, 2  ;;  %1766 = vmatprep.subr.bf16.mxu1 %v2216_v0  ;;  %1802 = vmatprep.subr.bf16.mxu0 %v2216_v0  ;;  %v2034_v39 = vld [vmem:[%s2716_s7 + $0x18] sm:$0xff]   ;;  %v2035_v40 = vld [vmem:[%s2716_s7 + $0x20] sm:$0xff]   ;;  %v2036_v41 = vld [vmem:[%s2716_s7 + $0x28] sm:$0xff]   ;;  %s490_s4 = sand.u32 1, %s2201_s26  }
  0x74   : > { %s2443_s23 = scalar_lea.vmem %s2709_s0, %s1558_s20  ;;  %s503_s25 = scalar_lea.vmem %s2710_s1, %s1558_s20  ;;  %v2529_v47 = vld [vmem:[%s2712_s3] ss:$0 sm:$0xff]  ;;  %v2535_v55 = vld [vmem:[#allocation5] ss:$0 sm:$0xff] }
  0x75   : > { %v2018_v3 = vld [vmem:[%s2443_s23] sm:$0xff]   ;;  %v1678_v6 = vld [vmem:[%s503_s25 + $0x8] sm:$0xff]   ;;  %v1679_v12 = vld [vmem:[%s503_s25 + $0x10] sm:$0xff]   ;;  %s1912_s16 = smul.u32 40, %s490_s4  ;;  %s2663_s27 = scalar_lea.hbm %s2752_s15, %s1632_s28 }
  0x76   : > { %v2019_v4 = vld [vmem:[%s2443_s23 + $0x20] sm:$0xff]   ;;  %1747 = vmatmul.mubr.msk.bf16.vlgmr.msra.gmra.mrb[0].mxu0 %vm637_vm1, %v2018_v3  ;;  %v1639_v10 = vunpack.c.l.bf16 %v1678_v6  ;;  %v1640_v11 = vunpack.c.h.bf16 %v1678_v6  ;;  %v1680_v13 = vld [vmem:[%s503_s25 + $0x18] sm:$0xff]   ;;  %v1643_v14 = vunpack.c.l.bf16 %v1679_v12  ;;  %v1644_v15 = vunpack.c.h.bf16 %v1679_v12  ;;  %v2020_v17 = vld [vmem:[%s2443_s23 + $0x8] sm:$0xff]   ;;  %s2668_s29 = scalar_lea.sflag [#allocation4], %s490_s4  ;;  %s2145_s24 = scalar_lea.vmem %s2144_s17, 1280 }
  0x77   : > { %1763 = vmatmul.mubr.msk.bf16.vlgmr.msra.gmra.mrb[0].mxu1 %vm637_vm1, %v2019_v4  ;;  %1750 = vmatprep.mubr.msk.bf16.mxu0 %vm2217_vm0, %v2216_v0  ;;  %v1634_v5 = vld [vmem:[%s503_s25] sm:$0xff]   ;;  %v1647_v19 = vunpack.c.l.bf16 %v1680_v13  ;;  %v1648_v20 = vunpack.c.h.bf16 %v1680_v13  ;;  %v2021_v28 = vld [vmem:[%s2443_s23 + $0x10] sm:$0xff]   ;;  %v2022_v32 = vld [vmem:[%s2443_s23 + $0x18] sm:$0xff]   ;;  %s2650_s13 = scalar_lea.vmem [#allocation8], %s1912_s16 }
  0x78   : > { %v1681_v7 = vld [vmem:[%s503_s25 + $0x20] sm:$0xff]   ;;  %1782 = vmatprep.mubr.msk.bf16.mxu1 %vm2217_vm0, %v2216_v0  ;;  %v1635_v8 = vunpack.c.l.bf16 %v1634_v5  ;;  %v1636_v9 = vunpack.c.h.bf16 %v1634_v5  ;;  %v2002_v21 = vpack.i.bf16 %v1644_v15, %v1643_v14  ;;  %1767 = vmatpush3.bf16.msra.mxu1 %v2023_v16  ;;  %v1996_v23 = vpack.i.bf16 %v1640_v11, %v1639_v10  ;;  %s1443_s23 = sshll.u32 %s2650_s13, 4  ;;  %s2658_s23 = int_to_ptr.vmem [resolvable:$true] %s1443_s23 }
  0x79   : > { %v1651_v24 = vunpack.c.l.bf16 %v1681_v7  ;;  %v1652_v25 = vunpack.c.h.bf16 %v1681_v7  ;;  %1768 = vmatprep.subr.bf16.mxu1 %v2216_v0  ;;  %v2007_v26 = vpack.i.bf16 %v1648_v20, %v1647_v19  ;;  %1803 = vmatpush3.bf16.msra.mxu0 %v2031_v36  ;;  %s2139_s14 = scalar_lea.vmem %s2658_s23, 640  ;;  %p2146_p4 = scmp.lt.s32.totalorder %s2658_s23, %s2144_s17 }
  0x7a   : > { %v1991_v18 = vpack.i.bf16 %v1636_v9, %v1635_v8  ;;  %2003 = vperm.xlu1 %2001, %v2002_v21   ;;  %1804 = vmatprep.subr.bf16.mxu0 %v2216_v0  ;;  %p2140_p9 = scmp.ne.s32.totalorder %s2658_s23, %s2139_s14  ;;  %p2147_p7 = scmp.lt.s32.totalorder %s2145_s24, %s2139_s14 }
  0x7b   : > { %v2012_v29 = vpack.i.bf16 %v1652_v25, %v1651_v24 }
  0x7c   : > { %1992 = vperm.xlu0 %1990, %v1991_v18   ;;  %1769 = vmatpush3.bf16.msra.mxu1 %v2024_v22  ;;  %p2141_p2 = pnand %p2140_p9, %p2753_p10  ;;  %p2148_p8 = por %p2147_p7, %p2146_p4 }
  0x7d   : > { %1770 = vmatprep.subr.bf16.mxu1 %v2216_v0  ;;  %1805 = vmatpush3.bf16.msra.mxu0 %v2032_v37 }
  0x7e   : > { %1751 = vmatmul.mubr.msk.bf16.gmra.mrb[4].mxu0 %vm637_vm1, %v2020_v17  ;;  %2008 = vperm.xlu1 %2001, %v2007_v26   ;;  %p2142_p3 = pneg %p2141_p2 }
  0x7f   : > { %1754 = vmatprep.mubr.msk.bf16.mxu0 %vm2217_vm0, %v2216_v0  ;;  %1806 = vmatprep.subr.bf16.mxu0 %v2216_v0 }
  0x80   : > { %1997 = vperm.xlu0 %1990, %v1996_v23   ;;  %1771 = vmatpush3.bf16.msra.mxu1 %v2025_v27  ;;  %p2149_p11 = pnand %p2148_p8, %p2142_p3 }
  0x81   : > { %1772 = vmatprep.subr.bf16.mxu1 %v2216_v0  ;;  %1807 = vmatpush3.bf16.msra.mxu0 %v2033_v38 }
  0x82   : > { %1808 = vmatprep.subr.bf16.mxu0 %v2216_v0 }
  0x84   : > { %2013 = vperm.xlu0 %1990, %v2012_v29   ;;  %1773 = vmatpush3.bf16.msra.mxu1 %v2026_v30 }
  0x85   : > { %1774 = vmatprep.subr.bf16.mxu1 %v2216_v0  ;;  %1809 = vmatpush3.bf16.msra.mxu0 %v2034_v39 }
  0x86   : > { %1755 = vmatmul.mubr.msk.bf16.gmra.mrb[8].mxu0 %vm637_vm1, %v2021_v28  ;;  %1810 = vmatprep.subr.bf16.mxu0 %v2216_v0 }
  0x87   : > { %1758 = vmatprep.mubr.msk.bf16.mxu0 %vm2217_vm0, %v2216_v0 }
  0x88   : > { %1775 = vmatpush3.bf16.msra.mxu1 %v2027_v31 }
  0x89   : > { %1776 = vmatprep.subr.bf16.mxu1 %v2216_v0  ;;  %1811 = vmatpush3.bf16.msra.mxu0 %v2035_v40 }
  0x8a   : > { %1812 = vmatprep.subr.bf16.mxu0 %v2216_v0 }
  0x8c   : > { %1777 = vmatpush3.bf16.msra.mxu1 %v2028_v33 }
  0x8d   : > { %1778 = vmatprep.subr.bf16.mxu1 %v2216_v0  ;;  %1813 = vmatpush3.bf16.msra.mxu0 %v2036_v41 }
  0x8e   : > { %1759 = vmatmul.mubr.msk.bf16.gmra.mrb[12].mxu0 %vm637_vm1, %v2022_v32  ;;  %1814 = vmatprep.subr.bf16.mxu0 %v2216_v0 }
  0x8f   : > { %1818 = vmatprep.mubr.msk.bf16.mxu0 %vm2217_vm0, %v2216_v0 }
  0x90   : > { %1779 = vmatpush3.bf16.msra.mxu1 %v2029_v34 }
  0x91   : > { %1780 = vmatprep.subr.bf16.mxu1 %v2216_v0 }
  0x94   : > { %1781 = vmatpush3.bf16.msra.mxu1 %v2030_v35 }
  0x95   : > { %1838 = vmatprep.subr.bf16.mxu1 %v2216_v0 }
  0xf9   : > { %v2004_v15 = vpop.permute.xlu1 %2003 }
  0xfa   : > { %v2005_v17 = vunpack.i.l.bf16 %v2004_v15  ;;  %v2006_v25 = vunpack.i.h.bf16 %v2004_v15 }
  0xfb   : > { %v1993_v42 = vpop.permute.xlu0 %1992 }
  0xfc   : > { %v1994_v45 = vunpack.i.l.bf16 %v1993_v42  ;;  %v1995_v48 = vunpack.i.h.bf16 %v1993_v42  ;;  %v600_v29 = vmul.f32 %v2005_v17, %v2529_v47  ;;  %v601_v32 = vmul.f32 %v2006_v25, %v2529_v47 }
  0xfd   : > { %v2009_v33 = vpop.permute.xlu1 %2008 }
  0xfe   : > { %v596_v50 = vmul.f32 %v1994_v45, %v2529_v47  ;;  %v597_v52 = vmul.f32 %v1995_v48, %v2529_v47  ;;  %v2010_v39 = vunpack.i.l.bf16 %v2009_v33 }
  0xff   : > { %v1998_v43 = vpop.permute.xlu0 %1997 }
 0x100   : > { %v1999_v61 = vunpack.i.l.bf16 %v1998_v43  ;;  %v2000_v7 = vunpack.i.h.bf16 %v1998_v43  ;;  %v2011_v43 = vunpack.i.h.bf16 %v2009_v33  ;;  %v602_v48 = vmul.f32 %v2010_v39, %v2529_v47 }
 0x102   : > { %v598_v14 = vmul.f32 %v1999_v61, %v2529_v47  ;;  %v599_v21 = vmul.f32 %v2000_v7, %v2529_v47  ;;  %v1573_v7 = vld [vmem:[%s2715_s6] ss:$0 sm:$0xff] }
 0x103   : > { %v2014_v44 = vpop.permute.xlu0 %2013 }
 0x104   : > { %v2015_v46 = vunpack.i.l.bf16 %v2014_v44  ;;  %v2016_v49 = vunpack.i.h.bf16 %v2014_v44 }
 0x106   : > { %v604_v51 = vmul.f32 %v2015_v46, %v2529_v47  ;;  %v605_v53 = vmul.f32 %v2016_v49, %v2529_v47 }
 0x149   : > { %v687_v54 = vpop.f32.mrb[0].mxu0 }
 0x14a   : > { %v719_v56 = vpop.f32.mrb[0].mxu1  ;;  %v688_v57 = vadd.f32 %v687_v54, %v596_v50  ;;  %v1748_v59 = vpop.f32.mrb[1].mxu0 }
 0x14b   : > { %v720_v58 = vadd.f32 %v719_v56, %v604_v51  ;;  %v1764_v60 = vpop.f32.mrb[1].mxu1  ;;  %v690_v62 = vpop.f32.mrb[2].mxu0 }
 0x14c   : > { %v722_v63 = vpop.f32.mrb[2].mxu1  ;;  %v733_v1 = vadd.f32 %v2535_v55, %v688_v57  ;;  %v691_v3 = vadd.f32 %v690_v62, %v597_v52  ;;  %v1749_v5 = vpop.f32.mrb[3].mxu0  ;;  %v603_v52 = vmul.f32 %v2011_v43, %v2529_v47  ;;  %v2037_v47 = vld [vmem:[%s2716_s7 + $0x30] sm:$0xff]  }
 0x14d   : > { %v741_v2 = vadd.f32 %v2535_v55, %v720_v58  ;;  %v723_v4 = vadd.f32 %v722_v63, %v605_v53  ;;  %v1765_v6 = vpop.f32.mrb[3].mxu1  ;;  %1815 = vmatpush3.bf16.msra.mxu0 %v2037_v47  ;;  %v2039_v63 = vld [vmem:[%s2718_s9] sm:$0xff]   ;;  %v2044_v5 = vld [vmem:[%s2718_s9 + $0x28] sm:$0xff]  }
 0x14e   : > { %v734_v9 = vadd.f32 %v2535_v55, %v691_v3  ;;  %v743_v11 = vmax.f32 %v733_v1, 0.0  ;;  %1816 = vmatprep.subr.bf16.mxu0 %v2216_v0  ;;  %v2040_v1 = vld [vmem:[%s2718_s9 + $0x8] sm:$0xff]   ;;  %v2042_v3 = vld [vmem:[%s2718_s9 + $0x18] sm:$0xff]   ;;  %v2045_v6 = vld [vmem:[%s2718_s9 + $0x30] sm:$0xff]  }
 0x14f   : > { %v751_v8 = vmax.f32 %v741_v2, 0.0  ;;  %v742_v10 = vadd.f32 %v2535_v55, %v723_v4  ;;  %v2041_v2 = vld [vmem:[%s2718_s9 + $0x10] sm:$0xff]   ;;  %v2043_v4 = vld [vmem:[%s2718_s9 + $0x20] sm:$0xff]  }
 0x150   : > { %v744_v12 = vmax.f32 %v734_v9, 0.0  ;;  %v1582_v47 = vld [vmem:[%s2717_s8] ss:$0 sm:$0xff] }
 0x151   : > { %v752_v13 = vmax.f32 %v742_v10, 0.0  ;;  %v695_v16 = vpop.f32.mrb[4].mxu0 }
 0x152   : > { %v753_v18 = vpack.c.bf16 %v744_v12, %v743_v11  ;;  %v696_v19 = vadd.f32 %v695_v16, %v598_v14  ;;  %v1752_v20 = vpop.f32.mrb[5].mxu0 }
 0x153   : > { %v757_v22 = vpack.c.bf16 %v752_v13, %v751_v8  ;;  %v698_v23 = vpop.f32.mrb[6].mxu0 }
 0x154   : > { %v735_v24 = vadd.f32 %v2535_v55, %v696_v19  ;;  %v699_v26 = vadd.f32 %v698_v23, %v599_v21  ;;  %v1753_v27 = vpop.f32.mrb[7].mxu0  ;;  %1783 = vmatmul.mubr.bf16.vlgmr.msra.gmra.mrb[4].mxu1 %v753_v18 }
 0x155   : > { %1786 = vmatprep.mubr.msk.bf16.mxu1 %vm2217_vm0, %v2216_v0  ;;  %1839 = vmatpush3.bf16.msra.mxu1 %v2039_v63 }
 0x156   : > { %v736_v28 = vadd.f32 %v2535_v55, %v699_v26  ;;  %v745_v30 = vmax.f32 %v735_v24, 0.0  ;;  %1840 = vmatprep.subr.bf16.mxu1 %v2216_v0 }
 0x158   : > { %v746_v31 = vmax.f32 %v736_v28, 0.0 }
 0x159   : > { %v703_v34 = vpop.f32.mrb[8].mxu0  ;;  %1841 = vmatpush3.bf16.msra.mxu1 %v2040_v1 }
 0x15a   : > { %v704_v35 = vadd.f32 %v703_v34, %v600_v29  ;;  %v1756_v36 = vpop.f32.mrb[9].mxu0  ;;  %v754_v37 = vpack.c.bf16 %v746_v31, %v745_v30  ;;  %1842 = vmatprep.subr.bf16.mxu1 %v2216_v0 }
 0x15b   : > { %v706_v38 = vpop.f32.mrb[10].mxu0 }
 0x15c   : > { %v737_v40 = vadd.f32 %v2535_v55, %v704_v35  ;;  %v707_v41 = vadd.f32 %v706_v38, %v601_v32  ;;  %v1757_v42 = vpop.f32.mrb[11].mxu0  ;;  %1787 = vmatmul.mubr.bf16.gmra.mrb[8].mxu1 %v754_v37 }
 0x15d   : > { %1790 = vmatprep.mubr.msk.bf16.mxu1 %vm2217_vm0, %v2216_v0  ;;  %1843 = vmatpush3.bf16.msra.mxu1 %v2041_v2 }
 0x15e   : > { %v738_v44 = vadd.f32 %v2535_v55, %v707_v41  ;;  %v747_v45 = vmax.f32 %v737_v40, 0.0  ;;  %1844 = vmatprep.subr.bf16.mxu1 %v2216_v0 }
 0x160   : > { %v748_v46 = vmax.f32 %v738_v44, 0.0 }
 0x161   : > { %v711_v49 = vpop.f32.mrb[12].mxu0  ;;  %1845 = vmatpush3.bf16.msra.mxu1 %v2042_v3 }
 0x162   : > { %v712_v50 = vadd.f32 %v711_v49, %v602_v48  ;;  %v1760_v51 = vpop.f32.mrb[13].mxu0  ;;  %v755_v53 = vpack.c.bf16 %v748_v46, %v747_v45  ;;  %1846 = vmatprep.subr.bf16.mxu1 %v2216_v0 }
 0x163   : > { %v714_v54 = vpop.f32.mrb[14].mxu0 }
 0x164   : > { %v739_v56 = vadd.f32 %v2535_v55, %v712_v50  ;;  %v715_v57 = vadd.f32 %v714_v54, %v603_v52  ;;  %v1761_v58 = vpop.f32.mrb[15].mxu0  ;;  %1791 = vmatmul.mubr.bf16.gmra.mrb[12].mxu1 %v755_v53  ;;  %v2046_v54 = vld [vmem:[%s2718_s9 + $0x38] sm:$0xff]  }
 0x165   : > { %1794 = vmatprep.mubr.msk.bf16.mxu1 %vm2217_vm0, %v2216_v0  ;;  %1847 = vmatpush3.bf16.msra.mxu1 %v2043_v4  ;;  %v2049_v58 = vld [vmem:[#allocation7 + $0x10] sm:$0xff]  }
 0x166   : > { %v740_v59 = vadd.f32 %v2535_v55, %v715_v57  ;;  %v749_v60 = vmax.f32 %v739_v56, 0.0  ;;  %v2038_v55 = vld [vmem:[%s2716_s7 + $0x38] sm:$0xff]   ;;  %1848 = vmatprep.subr.bf16.mxu1 %v2216_v0  ;;  %v2048_v57 = vld [vmem:[#allocation7 + $0x8] sm:$0xff]  }
 0x167   : > { %1817 = vmatpush3.bf16.msra.mxu0 %v2038_v55  ;;  %v2047_v56 = vld [vmem:[#allocation7] sm:$0xff]  }
 0x168   : > { %v750_v61 = vmax.f32 %v740_v59, 0.0  ;;  %1874 = vmatprep.subr.bf16.mxu0 %v2216_v0  ;;  %v2050_v59 = vld [vmem:[#allocation7 + $0x18] sm:$0xff]  }
 0x169   : > { %1849 = vmatpush3.bf16.msra.mxu1 %v2044_v5 }
 0x16a   : > { %v756_v62 = vpack.c.bf16 %v750_v61, %v749_v60  ;;  %1850 = vmatprep.subr.bf16.mxu1 %v2216_v0  ;;  %v2051_v60 = vld [vmem:[#allocation7 + $0x20] sm:$0xff]   ;;  %v2052_v61 = vld [vmem:[#allocation7 + $0x28] sm:$0xff]  }
 0x16c   : > { %1795 = vmatmul.mubr.bf16.gmra.mrb[16].mxu1 %v756_v62  ;;  %v2053_v62 = vld [vmem:[#allocation7 + $0x30] sm:$0xff]  }
 0x16d   : > { %1798 = vmatprep.mubr.msk.bf16.mxu1 %vm2217_vm0, %v2216_v0  ;;  %1851 = vmatpush3.bf16.msra.mxu1 %v2045_v6 }
 0x16e   : > { %1852 = vmatprep.subr.bf16.mxu1 %v2216_v0 }
 0x171   : > { %1853 = vmatpush3.bf16.msra.mxu1 %v2046_v54 }
 0x174   : > { %1799 = vmatmul.mubr.bf16.gmra.mrb[20].mxu1 %v757_v22 }
 0x175   : > { %1854 = vmatprep.mubr.msk.bf16.mxu1 %vm2217_vm0, %v2216_v0 }
 0x227   : > { %v863_v8 = vpop.f32.mrb[4].mxu1 }
 0x228   : > { %v864_v9 = vadd.f32 %v1573_v7, %v863_v8  ;;  %v1784_v10 = vpop.f32.mrb[5].mxu1 }
 0x229   : > { %v866_v11 = vpop.f32.mrb[6].mxu1 }
 0x22a   : > { %v867_v12 = vadd.f32 %v1573_v7, %v866_v11  ;;  %v1785_v13 = vpop.f32.mrb[7].mxu1  ;;  %v902_v14 = vmax.f32 %v864_v9, 0.0 }
 0x22c   : > { %v903_v15 = vmax.f32 %v867_v12, 0.0 }
 0x22e   : > { %v912_v16 = vpack.c.bf16 %v903_v15, %v902_v14 }
 0x22f   : > { %v871_v17 = vpop.f32.mrb[8].mxu1 }
 0x230   : > { %v872_v18 = vadd.f32 %v1573_v7, %v871_v17  ;;  %v1788_v19 = vpop.f32.mrb[9].mxu1  ;;  %1819 = vmatmul.mubr.bf16.vlgmr.msra.gmra.mrb[16].mxu0 %v912_v16 }
 0x231   : > { %v874_v20 = vpop.f32.mrb[10].mxu1  ;;  %1822 = vmatprep.mubr.msk.bf16.mxu0 %vm2217_vm0, %v2216_v0  ;;  %1875 = vmatpush3.bf16.msra.mxu0 %v2047_v56 }
 0x232   : > { %v875_v21 = vadd.f32 %v1573_v7, %v874_v20  ;;  %v1789_v22 = vpop.f32.mrb[11].mxu1  ;;  %v904_v23 = vmax.f32 %v872_v18, 0.0  ;;  %1876 = vmatprep.subr.bf16.mxu0 %v2216_v0 }
 0x234   : > { %v905_v24 = vmax.f32 %v875_v21, 0.0 }
 0x235   : > { %1877 = vmatpush3.bf16.msra.mxu0 %v2048_v57 }
 0x236   : > { %v913_v25 = vpack.c.bf16 %v905_v24, %v904_v23  ;;  %1878 = vmatprep.subr.bf16.mxu0 %v2216_v0 }
 0x237   : > { %v879_v26 = vpop.f32.mrb[12].mxu1 }
 0x238   : > { %v880_v27 = vadd.f32 %v1573_v7, %v879_v26  ;;  %v1792_v28 = vpop.f32.mrb[13].mxu1  ;;  %1823 = vmatmul.mubr.bf16.gmra.mrb[20].mxu0 %v913_v25 }
 0x239   : > { %v882_v29 = vpop.f32.mrb[14].mxu1  ;;  %1826 = vmatprep.mubr.msk.bf16.mxu0 %vm2217_vm0, %v2216_v0  ;;  %1879 = vmatpush3.bf16.msra.mxu0 %v2049_v58 }
 0x23a   : > { %v883_v30 = vadd.f32 %v1573_v7, %v882_v29  ;;  %v1793_v31 = vpop.f32.mrb[15].mxu1  ;;  %v906_v32 = vmax.f32 %v880_v27, 0.0  ;;  %1880 = vmatprep.subr.bf16.mxu0 %v2216_v0 }
 0x23c   : > { %v907_v33 = vmax.f32 %v883_v30, 0.0 }
 0x23d   : > { %1881 = vmatpush3.bf16.msra.mxu0 %v2050_v59 }
 0x23e   : > { %v914_v34 = vpack.c.bf16 %v907_v33, %v906_v32  ;;  %1882 = vmatprep.subr.bf16.mxu0 %v2216_v0 }
 0x23f   : > { %v887_v35 = vpop.f32.mrb[16].mxu1 }
 0x240   : > { %v888_v36 = vadd.f32 %v1573_v7, %v887_v35  ;;  %v1796_v37 = vpop.f32.mrb[17].mxu1  ;;  %1827 = vmatmul.mubr.bf16.gmra.mrb[24].mxu0 %v914_v34 }
 0x241   : > { %v890_v38 = vpop.f32.mrb[18].mxu1  ;;  %1830 = vmatprep.mubr.msk.bf16.mxu0 %vm2217_vm0, %v2216_v0  ;;  %1883 = vmatpush3.bf16.msra.mxu0 %v2051_v60 }
 0x242   : > { %v891_v39 = vadd.f32 %v1573_v7, %v890_v38  ;;  %v1797_v40 = vpop.f32.mrb[19].mxu1  ;;  %v908_v41 = vmax.f32 %v888_v36, 0.0  ;;  %1884 = vmatprep.subr.bf16.mxu0 %v2216_v0 }
 0x244   : > { %v909_v42 = vmax.f32 %v891_v39, 0.0 }
 0x245   : > { %1885 = vmatpush3.bf16.msra.mxu0 %v2052_v61 }
 0x246   : > { %v915_v43 = vpack.c.bf16 %v909_v42, %v908_v41  ;;  %1886 = vmatprep.subr.bf16.mxu0 %v2216_v0 }
 0x247   : > { %v895_v44 = vpop.f32.mrb[20].mxu1 }
 0x248   : > { %v896_v45 = vadd.f32 %v1573_v7, %v895_v44  ;;  %v1800_v46 = vpop.f32.mrb[21].mxu1  ;;  %1831 = vmatmul.mubr.bf16.gmra.mrb[28].mxu0 %v915_v43  ;;  %v2054_v44 = vld [vmem:[#allocation7 + $0x38] sm:$0xff]  }
 0x249   : > { %v898_v48 = vpop.f32.mrb[22].mxu1  ;;  %1834 = vmatprep.mubr.msk.bf16.mxu0 %vm2217_vm0, %v2216_v0  ;;  %1887 = vmatpush3.bf16.msra.mxu0 %v2053_v62 }
 0x24a   : > { %v899_v49 = vadd.f32 %v1573_v7, %v898_v48  ;;  %v1801_v50 = vpop.f32.mrb[23].mxu1  ;;  %v910_v51 = vmax.f32 %v896_v45, 0.0  ;;  %1888 = vmatprep.subr.bf16.mxu0 %v2216_v0  ;;  %v1591_v45 = vld [vmem:[%s2719_s10] ss:$0 sm:$0xff] }
 0x24c   : > { %v911_v52 = vmax.f32 %v899_v49, 0.0 }
 0x24d   : > { %1889 = vmatpush3.bf16.msra.mxu0 %v2054_v44 }
 0x24e   : > { %v916_v53 = vpack.c.bf16 %v911_v52, %v910_v51 }
 0x250   : > { %1835 = vmatmul.mubr.bf16.gmra.mrb[32].mxu0 %v916_v53 }
 0x251   : > { %1890 = vmatprep.mubr.msk.bf16.mxu0 %vm2217_vm0, %v2216_v0 }
 0x303   : > { %v1022_v55 = vpop.f32.mrb[16].mxu0 }
 0x304   : > { %v1023_v63 = vadd.f32 %v1582_v47, %v1022_v55  ;;  %v1820_v1 = vpop.f32.mrb[17].mxu0 }
 0x305   : > { %v1025_v2 = vpop.f32.mrb[18].mxu0 }
 0x306   : > { %v1026_v3 = vadd.f32 %v1582_v47, %v1025_v2  ;;  %v1821_v4 = vpop.f32.mrb[19].mxu0  ;;  %v1061_v5 = vmax.f32 %v1023_v63, 0.0 }
 0x308   : > { %v1062_v6 = vmax.f32 %v1026_v3, 0.0 }
 0x30a   : > { %v1071_v7 = vpack.c.bf16 %v1062_v6, %v1061_v5 }
 0x30b   : > { %v1030_v8 = vpop.f32.mrb[20].mxu0 }
 0x30c   : > { %v1031_v9 = vadd.f32 %v1582_v47, %v1030_v8  ;;  %v1824_v10 = vpop.f32.mrb[21].mxu0  ;;  %1855 = vmatmul.mubr.bf16.vlgmr.msra.gmra.mrb[24].mxu1 %v1071_v7 }
 0x30d   : > { %v1033_v11 = vpop.f32.mrb[22].mxu0  ;;  %1858 = vmatprep.mubr.msk.bf16.mxu1 %vm2217_vm0, %v2216_v0 }
 0x30e   : > { %v1034_v12 = vadd.f32 %v1582_v47, %v1033_v11  ;;  %v1825_v13 = vpop.f32.mrb[23].mxu0  ;;  %v1063_v14 = vmax.f32 %v1031_v9, 0.0 }
 0x310   : > { %v1064_v15 = vmax.f32 %v1034_v12, 0.0 }
 0x312   : > { %v1072_v16 = vpack.c.bf16 %v1064_v15, %v1063_v14 }
 0x313   : > { %v1038_v17 = vpop.f32.mrb[24].mxu0 }
 0x314   : > { %v1039_v18 = vadd.f32 %v1582_v47, %v1038_v17  ;;  %v1828_v19 = vpop.f32.mrb[25].mxu0  ;;  %1859 = vmatmul.mubr.bf16.gmra.mrb[28].mxu1 %v1072_v16 }
 0x315   : > { %v1041_v20 = vpop.f32.mrb[26].mxu0  ;;  %1862 = vmatprep.mubr.msk.bf16.mxu1 %vm2217_vm0, %v2216_v0 }
 0x316   : > { %v1042_v21 = vadd.f32 %v1582_v47, %v1041_v20  ;;  %v1829_v22 = vpop.f32.mrb[27].mxu0  ;;  %v1065_v23 = vmax.f32 %v1039_v18, 0.0 }
 0x318   : > { %v1066_v24 = vmax.f32 %v1042_v21, 0.0 }
 0x31a   : > { %v1073_v25 = vpack.c.bf16 %v1066_v24, %v1065_v23 }
 0x31b   : > { %v1046_v26 = vpop.f32.mrb[28].mxu0 }
 0x31c   : > { %v1047_v27 = vadd.f32 %v1582_v47, %v1046_v26  ;;  %v1832_v28 = vpop.f32.mrb[29].mxu0  ;;  %1863 = vmatmul.mubr.bf16.gmra.mrb[32].mxu1 %v1073_v25 }
 0x31d   : > { %v1049_v29 = vpop.f32.mrb[30].mxu0  ;;  %1866 = vmatprep.mubr.msk.bf16.mxu1 %vm2217_vm0, %v2216_v0  ;;  %v1600_v28 = vld [vmem:[%s2721_s12] ss:$0 sm:$0xff] }
 0x31e   : > { %v1050_v30 = vadd.f32 %v1582_v47, %v1049_v29  ;;  %v1833_v31 = vpop.f32.mrb[31].mxu0  ;;  %v1067_v32 = vmax.f32 %v1047_v27, 0.0 }
 0x320   : > { %v1068_v33 = vmax.f32 %v1050_v30, 0.0 }
 0x322   : > { %v1074_v34 = vpack.c.bf16 %v1068_v33, %v1067_v32 }
 0x323   : > { %v1054_v35 = vpop.f32.mrb[32].mxu0 }
 0x324   : > { %v1055_v36 = vadd.f32 %v1582_v47, %v1054_v35  ;;  %v1836_v37 = vpop.f32.mrb[33].mxu0  ;;  %1867 = vmatmul.mubr.bf16.gmra.mrb[36].mxu1 %v1074_v34 }
 0x325   : > { %v1057_v38 = vpop.f32.mrb[34].mxu0  ;;  %1870 = vmatprep.mubr.msk.bf16.mxu1 %vm2217_vm0, %v2216_v0 }
 0x326   : > { %v1058_v39 = vadd.f32 %v1582_v47, %v1057_v38  ;;  %v1837_v40 = vpop.f32.mrb[35].mxu0  ;;  %v1069_v41 = vmax.f32 %v1055_v36, 0.0 }
 0x328   : > { %v1070_v42 = vmax.f32 %v1058_v39, 0.0 }
 0x32a   : > { %v1075_v43 = vpack.c.bf16 %v1070_v42, %v1069_v41 }
 0x32c   : > { %1871 = vmatmul.mubr.bf16.gmra.mrb[40].mxu1 %v1075_v43 }
 0x3df   : > { %v1181_v46 = vpop.f32.mrb[24].mxu1 }
 0x3e0   : > { %v1182_v48 = vadd.f32 %v1591_v45, %v1181_v46  ;;  %v1856_v49 = vpop.f32.mrb[25].mxu1 }
 0x3e1   : > { %v1184_v50 = vpop.f32.mrb[26].mxu1 }
 0x3e2   : > { %v1185_v51 = vadd.f32 %v1591_v45, %v1184_v50  ;;  %v1857_v52 = vpop.f32.mrb[27].mxu1  ;;  %v1220_v53 = vmax.f32 %v1182_v48, 0.0 }
 0x3e4   : > { %v1221_v54 = vmax.f32 %v1185_v51, 0.0 }
 0x3e6   : > { %v1230_v56 = vpack.c.bf16 %v1221_v54, %v1220_v53 }
 0x3e7   : > { %v1189_v57 = vpop.f32.mrb[28].mxu1 }
 0x3e8   : > { %v1190_v58 = vadd.f32 %v1591_v45, %v1189_v57  ;;  %v1860_v59 = vpop.f32.mrb[29].mxu1  ;;  %1891 = vmatmul.mubr.bf16.vlgmr.msra.gmra.mrb[36].mxu0 %v1230_v56 }
 0x3e9   : > { %v1192_v60 = vpop.f32.mrb[30].mxu1  ;;  %1894 = vmatprep.mubr.msk.bf16.mxu0 %vm2217_vm0, %v2216_v0 }
 0x3ea   : > { %v1193_v61 = vadd.f32 %v1591_v45, %v1192_v60  ;;  %v1861_v62 = vpop.f32.mrb[31].mxu1  ;;  %v1222_v47 = vmax.f32 %v1190_v58, 0.0 }
 0x3ec   : > { %v1223_v55 = vmax.f32 %v1193_v61, 0.0 }
 0x3ee   : > { %v1231_v63 = vpack.c.bf16 %v1223_v55, %v1222_v47 }
 0x3ef   : > { %v1197_v1 = vpop.f32.mrb[32].mxu1 }
 0x3f0   : > { %v1198_v2 = vadd.f32 %v1591_v45, %v1197_v1  ;;  %v1864_v3 = vpop.f32.mrb[33].mxu1  ;;  %1895 = vmatmul.mubr.bf16.gmra.mrb[40].mxu0 %v1231_v63 }
 0x3f1   : > { %v1200_v4 = vpop.f32.mrb[34].mxu1  ;;  %1898 = vmatprep.mubr.msk.bf16.mxu0 %vm2217_vm0, %v2216_v0 }
 0x3f2   : > { %v1201_v5 = vadd.f32 %v1591_v45, %v1200_v4  ;;  %v1865_v6 = vpop.f32.mrb[35].mxu1  ;;  %v1224_v7 = vmax.f32 %v1198_v2, 0.0 }
 0x3f4   : > { %v1225_v8 = vmax.f32 %v1201_v5, 0.0 }
 0x3f6   : > { %v1232_v9 = vpack.c.bf16 %v1225_v8, %v1224_v7 }
 0x3f7   : > { %v1205_v10 = vpop.f32.mrb[36].mxu1 }
 0x3f8   : > { %v1206_v11 = vadd.f32 %v1591_v45, %v1205_v10  ;;  %v1868_v12 = vpop.f32.mrb[37].mxu1  ;;  %1899 = vmatmul.mubr.bf16.gmra.mrb[44].mxu0 %v1232_v9 }
 0x3f9   : > { %v1208_v13 = vpop.f32.mrb[38].mxu1  ;;  %1902 = vmatprep.mubr.msk.bf16.mxu0 %vm2217_vm0, %v2216_v0 }
 0x3fa   : > { %v1209_v14 = vadd.f32 %v1591_v45, %v1208_v13  ;;  %v1869_v15 = vpop.f32.mrb[39].mxu1  ;;  %v1226_v16 = vmax.f32 %v1206_v11, 0.0 }
 0x3fc   : > { %v1227_v17 = vmax.f32 %v1209_v14, 0.0 }
 0x3fe   : > { %v1233_v18 = vpack.c.bf16 %v1227_v17, %v1226_v16 }
 0x3ff   : > { %v1213_v19 = vpop.f32.mrb[40].mxu1 }
 0x400   : > { %v1214_v20 = vadd.f32 %v1591_v45, %v1213_v19  ;;  %v1872_v21 = vpop.f32.mrb[41].mxu1  ;;  %1903 = vmatmul.mubr.bf16.gmra.mrb[48].mxu0 %v1233_v18 }
 0x401   : > { %v1216_v22 = vpop.f32.mrb[42].mxu1  ;;  %1906 = vmatprep.mubr.msk.bf16.mxu0 %vm2217_vm0, %v2216_v0 }
 0x402   : > { %v1217_v23 = vadd.f32 %v1591_v45, %v1216_v22  ;;  %v1873_v24 = vpop.f32.mrb[43].mxu1  ;;  %v1228_v25 = vmax.f32 %v1214_v20, 0.0 }
 0x404   : > { %v1229_v26 = vmax.f32 %v1217_v23, 0.0 }
 0x406   : > { %v1234_v27 = vpack.c.bf16 %v1229_v26, %v1228_v25 }
 0x408   : > { %1907 = vmatmul.mubr.bf16.gmra.mrb[52].mxu0 %v1234_v27 }
 0x4bb   : > { %v1340_v29 = vpop.f32.mrb[36].mxu0 }
 0x4bc   : > { %v1892_v30 = vpop.f32.mrb[37].mxu0  ;;  %v1341_v32 = vadd.f32 %v1600_v28, %v1340_v29 }
 0x4bd   : > { %v1343_v31 = vpop.f32.mrb[38].mxu0 }
 0x4be   : > { %v1344_v33 = vadd.f32 %v1600_v28, %v1343_v31  ;;  %v1893_v34 = vpop.f32.mrb[39].mxu0 }
 0x4c0   : > { %v1656_v0 = vpack.c.bf16 %v1344_v33, %v1341_v32 }
 0x4c2   : > { %1657 = vst [vmem:[%s2650_s13] sm:$0xff] %v1656_v0  }
 0x4c3   : > { %v1348_v35 = vpop.f32.mrb[40].mxu0 }
 0x4c4   : > { %v1896_v36 = vpop.f32.mrb[41].mxu0  ;;  %v1349_v38 = vadd.f32 %v1600_v28, %v1348_v35 }
 0x4c5   : > { %v1351_v37 = vpop.f32.mrb[42].mxu0 }
 0x4c6   : > { %v1352_v39 = vadd.f32 %v1600_v28, %v1351_v37  ;;  %v1897_v40 = vpop.f32.mrb[43].mxu0 }
 0x4c8   : > { %v1661_v41 = vpack.c.bf16 %v1352_v39, %v1349_v38 }
 0x4ca   : > { %1682 = vst [vmem:[%s2650_s13 + $0x8] sm:$0xff] %v1661_v41  }
 0x4cb   : > { %v1356_v42 = vpop.f32.mrb[44].mxu0 }
 0x4cc   : > { %v1900_v43 = vpop.f32.mrb[45].mxu0  ;;  %v1357_v45 = vadd.f32 %v1600_v28, %v1356_v42 }
 0x4cd   : > { %v1359_v44 = vpop.f32.mrb[46].mxu0 }
 0x4ce   : > { %v1360_v46 = vadd.f32 %v1600_v28, %v1359_v44  ;;  %v1901_v48 = vpop.f32.mrb[47].mxu0 }
 0x4d0   : > { %v1666_v49 = vpack.c.bf16 %v1360_v46, %v1357_v45 }
 0x4d2   : > { %1683 = vst [vmem:[%s2650_s13 + $0x10] sm:$0xff] %v1666_v49  }
 0x4d3   : > { %v1364_v50 = vpop.f32.mrb[48].mxu0 }
 0x4d4   : > { %v1904_v51 = vpop.f32.mrb[49].mxu0  ;;  %v1365_v53 = vadd.f32 %v1600_v28, %v1364_v50 }
 0x4d5   : > { %v1367_v52 = vpop.f32.mrb[50].mxu0 }
 0x4d6   : > { %v1368_v54 = vadd.f32 %v1600_v28, %v1367_v52  ;;  %v1905_v56 = vpop.f32.mrb[51].mxu0 }
 0x4d8   : > { %v1671_v57 = vpack.c.bf16 %v1368_v54, %v1365_v53 }
 0x4da   : > { %1684 = vst [vmem:[%s2650_s13 + $0x18] sm:$0xff] %v1671_v57  }
 0x4db   : > { %v1372_v58 = vpop.f32.mrb[52].mxu0 }
 0x4dc   : > { %v1908_v59 = vpop.f32.mrb[53].mxu0  ;;  %v1373_v61 = vadd.f32 %v1600_v28, %v1372_v58 }
 0x4dd   : > { %v1375_v60 = vpop.f32.mrb[54].mxu0 }
 0x4de   : > { %v1376_v62 = vadd.f32 %v1600_v28, %v1375_v60  ;;  %v1909_v47 = vpop.f32.mrb[55].mxu0 }
 0x4e0   : > { %v1676_v55 = vpack.c.bf16 %v1376_v62, %v1373_v61 }
 0x4e2   : > { %1685 = vst [vmem:[%s2650_s13 + $0x20] sm:$0xff] %v1676_v55  }
 0x4e3   : > { %2152 = shalt.err (!%p2149_p11)
}
 0x4e4   : > { %s2153_s19 = scalar_lea.hbm %s2663_s27, 640  ;;  %s2157_s30 = scalar_lea.hbm %s2752_s15, 1280 }
 0x4e5   : > { %p2154_p13 = scmp.ne.s32.totalorder %s2663_s27, %s2153_s19  ;;  %p2158_p6 = scmp.lt.u32.totalorder %s2663_s27, %s2752_s15 }
 0x4e6   : > { %p2159_p5 = scmp.lt.u32.totalorder %s2157_s30, %s2153_s19  ;;  %p2161_p9 = scmp.lt.u32.totalorder %s2153_s19, %s2663_s27 }
 0x4e7   : > { %p2155_p1 = pnand %p2154_p13, %p2753_p10 }
 0x4e8   : > { %p2160_p12 = por %p2159_p5, %p2158_p6 }
 0x4e9   : > { %p2156_p0 = pneg %p2155_p1 }
 0x4ea   : > { %p2162_p2 = por %p2161_p9, %p2160_p12 }
 0x4ec   : > { %p2163_p3 = pnand %p2162_p2, %p2156_p0 }
 0x4ee   : > { %2166 = shalt.err (!%p2163_p3)
}
 0x4ef   : > { %s2220_s28 = smov 64   ;;  %s2221_s25 = smov 4  }
 0x4f0   : > { %1925 = dma.vmem_to_hbm [thread:$0]  (%p2753_p10), %s2658_s23, 640, %s2663_s27, %s2668_s29, %s2220_s28, %s2220_s28, %s2221_s25  }
 0x4f1 PF: > { %s2754_s21 = sld [smem:[#allocation14_spill]]  ;;  %s2755_s14 = sld [smem:[#allocation12_spill]] }
 0x4f2   : > { %s2756_s22 = sld [smem:[#allocation17_spill]] }
 0x4f7   : > { %p1947_p4 = scmp.ge.s32.totalorder %s2754_s21, 2  ;;  %s1458_s17 = sand.u32 1, %s2755_s14  }
 0x4f8   : > { %p2757_p7 = scmp.ne.s32.totalorder %s2756_s22, 0  ;;  %s1459_s24 = scalar_lea.sflag [#allocation4], %s1458_s17 }
 0x4fa   : > { %p1938_p8 = pnand %p1947_p4, %p2757_p7 }
 0x4fc   : > { %2192 = dma.done.wait (!%p1938_p8), %s1459_s24, 640  }
 0x4fd   : > { %2194 = vsyncadd (!%p1938_p8), %s1459_s24, 4294966656  ;;  %s2758_s28 = sld [smem:[#allocation15_spill]]  ;;  %s2759_s19 = sld [smem:[#allocation13_spill]] }
 0x4fe   : > { %s2760_s27 = sld [smem:[#allocation16_spill]]  ;;  %s2761_s25 = smov %s2201_s26 }
 0x503   : > { %p25_p11 = scmp.ge.s32.totalorder %s2758_s28, 4   ;;  %s2762_s26 = smov %s2759_s19 }
 0x505   :  { %27 = sbr.rel (!%p25_p11) target bundleno = 8 (0x8), region = 123 }
 0x50c   :  { %1464 = vsyncpa [#allocation3], 1 }
 0x50d   :  { %1466 = vsyncpa [#allocation3 + $0x1], 1 }
 0x50e   :  { %1467 = vsyncpa [#allocation6], 1 }
 0x50f   :  { %1468 = vsyncpa [#allocation4], 1 }
 0x510   :  { %1470 = vsyncpa [#allocation4 + $0x1], 1 }

</bundles_post_ra>
